<compile_context>
chip_gen: v6e
topology: v6e:2x2x1
jax: 0.10.0
libtpu: 0.0.40
codegen_flags: <defaults>
</compile_context>

<pallas_src>
import functools
import math

import jax
import jax.numpy as jnp
from jax.experimental import pallas as pl
from jax.experimental.pallas import tpu as pltpu


LANE = 128  # channel padding target: lane-dense stores + aligned MXU K/N dims


def _round_up(x, m):
    return (x + m - 1) // m * m


def _vmem_capacity_bytes():
    """Per-core VMEM capacity (generation aware), with a conservative fallback."""
    try:
        return int(pltpu.get_tpu_info().vmem_capacity_bytes)
    except Exception:
        return 64 * 1024 * 1024  # v7x per-core VMEM (smallest of the targets)


# ----------------------------------------------------------------------------
# Pallas kernel: fused 3x3 conv (stride s) + folded-BN bias + ReLU.
# One (batch, row-strip) tile per grid step; manual double-buffered input DMA.
# Input in HBM is column-padded (B, H, W+2, Cin) with zero border columns;
# output is written column-padded (B, Hout, Wout+2, Cout) with zero borders.
# ----------------------------------------------------------------------------
def _conv3x3_bn_relu_kernel(x_hbm, w_ref, b_ref, o_ref, in_buf, sem, *,
                            stride, tile_h, n_strips, h_in):
    # x_hbm : (B, H, Wp, Cin)          column-padded input, left in HBM (pl.ANY)
    # w_ref : (3, 3, Cin, Cout)        HWIO weights, BN scale folded, VMEM resident
    # b_ref : (1, Cout)                folded BN bias (f32), VMEM resident
    # o_ref : (1, tile_h, Wout+2, Cout) output strip (blocked, Pallas-pipelined)
    # in_buf: (2, th_in, Wp, Cin)      double-buffered input strips (VMEM scratch)
    # sem   : DMA semaphores, one per buffer slot
    s = stride
    th_in = s * (tile_h - 1) + 3          # input rows per strip (incl. 2-row halo)
    row_step = s * tile_h                 # input row offset between strips

    b = pl.program_id(0)
    t = pl.program_id(1)
    slot = t % 2

    cin = w_ref.shape[2]
    cout = w_ref.shape[3]
    wp = in_buf.shape[2]                  # column-padded input width (W + 2)
    wp_out = o_ref.shape[2]               # column-padded output width (Wout + 2)
    w_out = wp_out - 2

    # --- static per-case DMA geometry (row halo is handled in VMEM) ----------
    # strip 0 needs the (missing) top pad row -> DMA lands at buffer row 1.
    first_rows = min(th_in - 1, h_in)
    first_tail = th_in - 1 - first_rows            # 0 or 1 (only when n_strips==1)
    last_lo = (n_strips - 1) * row_step - 1        # HBM start row of last strip
    last_rows = min(th_in, h_in - last_lo) if n_strips > 1 else first_rows
    last_is_short = (n_strips > 1) and (last_rows < th_in)

    def copy_first(slot_):
        return pltpu.make_async_copy(
            x_hbm.at[b, pl.ds(0, first_rows)],
            in_buf.at[slot_, pl.ds(1, first_rows)],
            sem.at[slot_])

    def copy_interior(strip, slot_):
        return pltpu.make_async_copy(
            x_hbm.at[b, pl.ds(strip * row_step - 1, th_in)],
            in_buf.at[slot_, pl.ds(0, th_in)],
            sem.at[slot_])

    def copy_last(slot_):
        return pltpu.make_async_copy(
            x_hbm.at[b, pl.ds(last_lo, last_rows)],
            in_buf.at[slot_, pl.ds(0, last_rows)],
            sem.at[slot_])

    # --- prime the pipeline at the first strip of every batch element --------
    # The strip axis is "arbitrary" (in-order on one core) so priming/prefetch
    # is self-contained per batch element; the batch axis is "parallel" and may
    # be split across TensorCores (scratch + semaphores are per-core).
    @pl.when(t == 0)
    def _():
        copy_first(slot).start()

    # --- wait for the current strip's DMA (shape must match the issued copy) -
    if n_strips == 1:
        copy_first(slot).wait()
    else:
        @pl.when(t == 0)
        def _():
            copy_first(slot).wait()

        if last_is_short:
            @pl.when(t == n_strips - 1)
            def _():
                copy_last(slot).wait()

            if n_strips > 2:
                @pl.when((t > 0) & (t < n_strips - 1))
                def _():
                    copy_interior(t, slot).wait()
        else:
            @pl.when(t > 0)
            def _():
                copy_interior(t, slot).wait()

    # --- prefetch the next strip of the same batch (overlaps with compute) ---
    if n_strips > 1:
        @pl.when(t + 1 < n_strips)
        def _():
            nxt = t + 1
            if last_is_short:
                @pl.when(nxt == n_strips - 1)
                def _():
                    copy_last(1 - slot).start()

                if n_strips > 2:
                    @pl.when(nxt < n_strips - 1)
                    def _():
                        copy_interior(nxt, 1 - slot).start()
            else:
                copy_interior(nxt, 1 - slot).start()

    # --- zero-fill the halo rows that do not exist in HBM --------------------
    zrow = jnp.zeros((1, wp, cin), in_buf.dtype)

    @pl.when(t == 0)
    def _():
        in_buf[slot, 0:1] = zrow                          # top pad row
        if first_tail > 0:                                 # bottom pad (n_strips==1)
            in_buf[slot, 1 + first_rows:1 + first_rows + first_tail] = zrow

    if last_is_short:
        @pl.when(t == n_strips - 1)
        def _():
            in_buf[slot, last_rows:th_in] = zrow           # bottom pad row

    # --- fused conv + bias + ReLU --------------------------------------------
    cur = in_buf.at[slot]                 # (th_in, Wp, Cin) view of current slot

    # Direct conv: 9 shifted (tile_h*w_out, Cin) @ (Cin, Cout) MXU matmuls with
    # K = Cin lane-padded to 128.  For stride 2 only the needed outputs are
    # read/computed (strided pl.ds reads).
    acc = jnp.zeros((tile_h * w_out, cout), jnp.float32)
    for kh in range(3):
        for kw in range(3):
            if s == 1:
                patch = cur[pl.ds(kh, tile_h), pl.ds(kw, w_out), :]
            else:
                patch = cur[pl.ds(kh, tile_h, stride=s),
                            pl.ds(kw, w_out, stride=s), :]
            acc = acc + jnp.dot(patch.reshape(tile_h * w_out, cin),
                                w_ref[kh, kw],
                                preferred_element_type=jnp.float32)

    y = jnp.maximum(acc + b_ref[...], 0.0)               # folded-BN bias + ReLU
    y = y.reshape(tile_h, w_out, cout).astype(o_ref.dtype)

    # Interior columns carry the conv result; border columns are stored as zero
    # so the next layer's input is already column-padded in HBM.
    zcol = jnp.zeros((tile_h, 1, cout), o_ref.dtype)
    o_ref[0, :, 1:1 + w_out, :] = y
    o_ref[0, :, 0:1, :] = zcol
    o_ref[0, :, wp_out - 1:wp_out, :] = zcol


# ----------------------------------------------------------------------------
# Wrapper: strip-size selection + pallas_call
# ----------------------------------------------------------------------------
def _pick_tile_h(h_out, stride, wp_in, w_out, cin, cout, act_bytes,
                 budget_bytes, max_tile_h=None):
    """Largest divisor of h_out whose double-buffered strips fit the budget."""
    best = 1
    for th in range(1, h_out + 1):
        if h_out % th:
            continue
        if max_tile_h is not None and th > max_tile_h:
            continue
        th_in = stride * (th - 1) + 3
        need = 2 * th_in * wp_in * cin * act_bytes          # input double buffer
        need += 2 * th * (w_out + 2) * cout * act_bytes     # output double buffer
        need += 4 * th * w_out * cout * 4                   # f32 acc + temporaries
        need += 2 * th * w_out * cin * 4                    # per-tap patch temps
        if need <= budget_bytes:
            best = th
    return best


def conv_bn_relu(x_colpad, w_hwio, bias, stride, *, max_tile_h=None):
    """Fused Conv2d(3x3, pad=1, no bias) + folded BN(eval) + ReLU via Pallas.

    x_colpad: (B, H, W+2, Cin)  column-padded NHWC; Cin lane-padded (mult. of 128).
    w_hwio:   (3, 3, Cin, Cout) BN-scale-folded, lane-padded weights.
    bias:     (Cout,)           folded BN bias (f32).
    Returns:  (B, Hout, Wout+2, Cout) column-padded output (borders are zero).
    """
    B, H, WP, cin = x_colpad.shape
    W = WP - 2
    k0, k1, wcin, cout = w_hwio.shape
    assert (k0, k1) == (3, 3) and wcin == cin
    s = stride
    h_out = (H - 1) // s + 1
    w_out = (W - 1) // s + 1
    wp_out = w_out + 2

    act_bytes = jnp.dtype(x_colpad.dtype).itemsize
    w_bytes = 2 * (9 * cin * cout * jnp.dtype(w_hwio.dtype).itemsize + 4 * cout)
    vmem_cap = _vmem_capacity_bytes()                 # 64 MiB v7x, 128 MiB v5e/v6e
    vmem_budget = min(max(vmem_cap // 2, 32 * 1024 * 1024), 64 * 1024 * 1024)
    strip_budget = max(vmem_budget // 2 - w_bytes, 2 * 1024 * 1024)
    tile_h = _pick_tile_h(h_out, s, WP, w_out, cin, cout, act_bytes,
                          budget_bytes=strip_budget, max_tile_h=max_tile_h)
    n_strips = h_out // tile_h
    th_in = s * (tile_h - 1) + 3

    kernel = functools.partial(_conv3x3_bn_relu_kernel, stride=s,
                               tile_h=tile_h, n_strips=n_strips, h_in=H)

    return pl.pallas_call(
        kernel,
        out_shape=jax.ShapeDtypeStruct((B, h_out, wp_out, cout), x_colpad.dtype),
        grid=(B, n_strips),
        in_specs=[
            pl.BlockSpec(memory_space=pl.ANY),                           # HBM input
            pl.BlockSpec((3, 3, cin, cout), lambda b, t: (0, 0, 0, 0)),  # VMEM resident
            pl.BlockSpec((1, cout), lambda b, t: (0, 0)),                # VMEM resident
        ],
        out_specs=pl.BlockSpec((1, tile_h, wp_out, cout),
                               lambda b, t: (b, t, 0, 0)),
        scratch_shapes=[
            pltpu.VMEM((2, th_in, WP, cin), x_colpad.dtype),   # double-buffered strips
            pltpu.SemaphoreType.DMA((2,)),
        ],
        compiler_params=pltpu.CompilerParams(
            dimension_semantics=("parallel", "arbitrary"),
            vmem_limit_bytes=int(vmem_budget),
        ),
    )(x_colpad, w_hwio, bias.reshape(1, -1).astype(jnp.float32))


# ----------------------------------------------------------------------------
# Parameter construction (mirrors the PyTorch __init__; BN folded + padded)
# ----------------------------------------------------------------------------
def make_backbone_params(key, in_channel, out_channels, layer_nums):
    eps = 1e-3
    params = []      # per block: list of (w_hwio_folded_padded f32, bias_padded f32)
    c_in = in_channel
    for i, c_out in enumerate(out_channels):
        block = []
        for j in range(1 + layer_nums[i]):
            ci = c_in if j == 0 else c_out
            key, kw_, kg, kb, km, kv = jax.random.split(key, 6)
            # kaiming_normal_, mode='fan_out', relu: std = sqrt(2 / (Cout*3*3))
            std = math.sqrt(2.0 / (c_out * 3 * 3))
            w_oihw = jax.random.normal(kw_, (c_out, ci, 3, 3), jnp.float32) * std
            gamma = jax.random.uniform(kg, (c_out,), jnp.float32, 0.5, 1.5)
            beta = jax.random.normal(kb, (c_out,), jnp.float32) * 0.1
            r_mean = jax.random.normal(km, (c_out,), jnp.float32) * 0.1
            r_var = jax.random.uniform(kv, (c_out,), jnp.float32, 0.5, 1.5)
            # TODO(synk): training-mode BatchNorm (batch statistics / momentum
            # updates) is not modeled; eval-mode BN is folded into the conv.
            scale = gamma / jnp.sqrt(r_var + eps)
            bias = beta - r_mean * scale
            w_hwio = jnp.transpose(w_oihw, (2, 3, 1, 0)) * scale   # fold BN scale
            ci_p, co_p = _round_up(ci, LANE), _round_up(c_out, LANE)
            w_pad = jnp.pad(w_hwio, ((0, 0), (0, 0),
                                     (0, ci_p - ci), (0, co_p - c_out)))
            b_pad = jnp.pad(bias, ((0, co_p - c_out),))
            block.append((w_pad, b_pad))
        params.append(block)
        c_in = c_out
    return params


def backbone_forward(x_nchw, params, out_channels, layer_strides,
                     compute_dtype=jnp.float32, max_tile_h=None):
    """Matches Backbone.forward: returns list of NCHW feature maps (f32)."""
    x = jnp.transpose(x_nchw, (0, 2, 3, 1))                       # NCHW -> NHWC
    cin = x.shape[-1]
    cpad = _round_up(cin, LANE) - cin
    # Single host-side pad at the network input: 1-column zero halo + lane-pad
    # channels.  All later layers stay column-padded in HBM (written that way
    # by the kernel), so no per-layer activation pads are needed.
    x = jnp.pad(x, ((0, 0), (0, 0), (1, 1), (0, cpad))).astype(compute_dtype)
    outs = []
    for i, block in enumerate(params):
        for j, (w, bias) in enumerate(block):
            stride = layer_strides[i] if j == 0 else 1
            x = conv_bn_relu(x, w.astype(compute_dtype), bias, stride,
                             max_tile_h=max_tile_h)
        # Drop the column halo + channel padding only at block outputs.
        y = x[:, :, 1:-1, :out_channels[i]].astype(jnp.float32)
        outs.append(jnp.transpose(y, (0, 3, 1, 2)))
    return outs


# ----------------------------------------------------------------------------
# Pure-JAX reference (lax.conv) for verification
# ----------------------------------------------------------------------------
def backbone_reference(x_nchw, params, out_channels, layer_strides):
    x = jnp.transpose(x_nchw, (0, 2, 3, 1)).astype(jnp.float32)
    outs = []
    for i, block in enumerate(params):
        for j, (w_pad, b_pad) in enumerate(block):
            stride = layer_strides[i] if j == 0 else 1
            cin = x.shape[-1]
            cout = out_channels[i]
            w = w_pad[:, :, :cin, :cout]
            bias = b_pad[:cout]
            dn = jax.lax.conv_dimension_numbers(x.shape, w.shape,
                                                ("NHWC", "HWIO", "NHWC"))
            x = jax.lax.conv_general_dilated(
                x, w, (stride, stride), ((1, 1), (1, 1)), dimension_numbers=dn)
            x = jnp.maximum(x + bias, 0.0)
        outs.append(jnp.transpose(x, (0, 3, 1, 2)))
    return outs


# ----------------------------------------------------------------------------
if __name__ == "__main__":
    # Small config consistent with Backbone(in_channel, out_channels, layer_nums).
    B, C_in, H, W = 2, 4, 16, 16
    out_channels = [8, 16, 32]
    layer_nums = [1, 1, 1]
    layer_strides = [2, 2, 2]

    key = jax.random.PRNGKey(0)
    key, kx = jax.random.split(key)
    x = jax.random.normal(kx, (B, C_in, H, W), jnp.float32)       # NCHW input
    params = make_backbone_params(key, C_in, out_channels, layer_nums)

    # f32 run.  max_tile_h=4 forces multiple row strips so the halo handling /
    # manual DMA double-buffering path is exercised even at this toy resolution.
    outs = backbone_forward(x, params, out_channels, layer_strides,
                            compute_dtype=jnp.float32, max_tile_h=4)
    outs = [jax.block_until_ready(o) for o in outs]

    refs = backbone_reference(x, params, out_channels, layer_strides)
    expected_shapes = [(B, 8, 8, 8), (B, 16, 4, 4), (B, 32, 2, 2)]
    for o, r, shp in zip(outs, refs, expected_shapes):
        assert o.shape == shp, (o.shape, shp)
        err = float(jnp.max(jnp.abs(o - r)))
        assert jnp.allclose(o, r, rtol=1e-3, atol=1e-3), err

    # bf16 run (v6e/v7x fast path: half the VMEM/HBM traffic, bf16 MXU).
    outs_bf16 = backbone_forward(x, params, out_channels, layer_strides,
                                 compute_dtype=jnp.bfloat16, max_tile_h=4)
    outs_bf16 = [jax.block_until_ready(o) for o in outs_bf16]
    for o, shp in zip(outs_bf16, expected_shapes):
        assert o.shape == shp, (o.shape, shp)
        assert bool(jnp.all(jnp.isfinite(o)))

    print("KERNEL_OK")
</pallas_src>

<mosaic_0001>
module attributes {stable_mosaic.version = 11 : i64} {
  func.func @_conv3x3_bn_relu_kernel(%arg0: i32, %arg1: i32, %arg2: memref<2x16x18x128xf32, #tpu.memory_space<any>>, %arg3: memref<3x3x128x128xf32, #tpu.memory_space<vmem>>, %arg4: memref<1x128xf32, #tpu.memory_space<vmem>>, %arg5: memref<1x4x10x128xf32, #tpu.memory_space<vmem>>, %arg6: memref<2x9x18x128xf32, #tpu.memory_space<vmem>>, %arg7: memref<2x!tpu.dma_semaphore, #tpu.memory_space<semaphore_mem>>) attributes {dimension_semantics = [#tpu.dimension_semantics<parallel>, #tpu.dimension_semantics<arbitrary>], iteration_bounds = array<i64: 2, 2>, scalar_prefetch = 0 : i64, scratch_operands = 2 : i64, tpu.core_type = #tpu.core_type<tc>, window_params = [{}, {pipeline_mode = #tpu.pipeline_mode<synchronous>, transform_indices = @transform_1, window_bounds = array<i64: 3, 3, 128, 128>}, {pipeline_mode = #tpu.pipeline_mode<synchronous>, transform_indices = @transform_2, window_bounds = array<i64: 1, 128>}, {transform_indices = @transform_3, window_bounds = array<i64: 1, 4, 10, 128>}]} {
    %c2_i32 = arith.constant 2 : i32
    %c0_i32 = arith.constant 0 : i32
    %0 = arith.cmpi eq, %c2_i32, %c0_i32 : i32
    %c1_i32 = arith.constant 1 : i32
    %1 = arith.select %0, %c1_i32, %c2_i32 : i32
    %2 = arith.remsi %arg1, %1 : i32
    %c0_i32_0 = arith.constant 0 : i32
    %3 = arith.cmpi ne, %2, %c0_i32_0 : i32
    %c0_i32_1 = arith.constant 0 : i32
    %4 = arith.cmpi slt, %2, %c0_i32_1 : i32
    %c0_i32_2 = arith.constant 0 : i32
    %5 = arith.cmpi slt, %1, %c0_i32_2 : i32
    %6 = arith.xori %4, %5 : i1
    %7 = arith.andi %6, %3 : i1
    %8 = arith.addi %2, %1 : i32
    %9 = arith.select %7, %8, %2 : i32
    %c0_i32_3 = arith.constant 0 : i32
    %10 = arith.cmpi eq, %arg1, %c0_i32_3 : i32
    %11 = arith.extui %10 : i1 to i32
    %c0_i32_4 = arith.constant 0 : i32
    %12 = arith.cmpi ne, %11, %c0_i32_4 : i32
    scf.if %12 {
      %c0_i32_126 = arith.constant 0 : i32
      %c0_i32_127 = arith.constant 0 : i32
      %c0_i32_128 = arith.constant 0 : i32
      %116 = tpu.memref_slice %arg2[%arg0, %c0_i32_126, %c0_i32_127, %c0_i32_128] : memref<2x16x18x128xf32, #tpu.memory_space<any>> -> memref<1x8x18x128xf32, #tpu.memory_space<any>>
      %117 = tpu.memref_squeeze %116 : memref<1x8x18x128xf32, #tpu.memory_space<any>> -> memref<8x18x128xf32, #tpu.memory_space<any>>
      %c1_i32_129 = arith.constant 1 : i32
      %c0_i32_130 = arith.constant 0 : i32
      %c0_i32_131 = arith.constant 0 : i32
      %118 = tpu.memref_slice %arg6[%9, %c1_i32_129, %c0_i32_130, %c0_i32_131] : memref<2x9x18x128xf32, #tpu.memory_space<vmem>> -> memref<1x8x18x128xf32, #tpu.memory_space<vmem>>
      %119 = tpu.memref_squeeze %118 : memref<1x8x18x128xf32, #tpu.memory_space<vmem>> -> memref<8x18x128xf32, #tpu.memory_space<vmem>>
      %120 = tpu.memref_slice %arg7[%9] : memref<2x!tpu.dma_semaphore, #tpu.memory_space<semaphore_mem>> -> memref<1x!tpu.dma_semaphore, #tpu.memory_space<semaphore_mem>>
      %121 = tpu.memref_squeeze %120 : memref<1x!tpu.dma_semaphore, #tpu.memory_space<semaphore_mem>> -> memref<!tpu.dma_semaphore, #tpu.memory_space<semaphore_mem>>
      tpu.enqueue_dma source(%117 : memref<8x18x128xf32, #tpu.memory_space<any>>) target(%119 : memref<8x18x128xf32, #tpu.memory_space<vmem>>) target_semaphore(%121 : memref<!tpu.dma_semaphore, #tpu.memory_space<semaphore_mem>>)
    } else {
    }
    %c0_i32_5 = arith.constant 0 : i32
    %13 = arith.cmpi eq, %arg1, %c0_i32_5 : i32
    %14 = arith.extui %13 : i1 to i32
    %c0_i32_6 = arith.constant 0 : i32
    %15 = arith.cmpi ne, %14, %c0_i32_6 : i32
    scf.if %15 {
      %c0_i32_126 = arith.constant 0 : i32
      %c0_i32_127 = arith.constant 0 : i32
      %c0_i32_128 = arith.constant 0 : i32
      %116 = tpu.memref_slice %arg2[%arg0, %c0_i32_126, %c0_i32_127, %c0_i32_128] : memref<2x16x18x128xf32, #tpu.memory_space<any>> -> memref<1x8x18x128xf32, #tpu.memory_space<any>>
      %117 = tpu.memref_squeeze %116 : memref<1x8x18x128xf32, #tpu.memory_space<any>> -> memref<8x18x128xf32, #tpu.memory_space<any>>
      %c1_i32_129 = arith.constant 1 : i32
      %c0_i32_130 = arith.constant 0 : i32
      %c0_i32_131 = arith.constant 0 : i32
      %118 = tpu.memref_slice %arg6[%9, %c1_i32_129, %c0_i32_130, %c0_i32_131] : memref<2x9x18x128xf32, #tpu.memory_space<vmem>> -> memref<1x8x18x128xf32, #tpu.memory_space<vmem>>
      %119 = tpu.memref_squeeze %118 : memref<1x8x18x128xf32, #tpu.memory_space<vmem>> -> memref<8x18x128xf32, #tpu.memory_space<vmem>>
      %120 = tpu.memref_slice %arg7[%9] : memref<2x!tpu.dma_semaphore, #tpu.memory_space<semaphore_mem>> -> memref<1x!tpu.dma_semaphore, #tpu.memory_space<semaphore_mem>>
      %121 = tpu.memref_squeeze %120 : memref<1x!tpu.dma_semaphore, #tpu.memory_space<semaphore_mem>> -> memref<!tpu.dma_semaphore, #tpu.memory_space<semaphore_mem>>
      tpu.wait_dma2 semaphore(%121 : memref<!tpu.dma_semaphore, #tpu.memory_space<semaphore_mem>>) src(%117 : memref<8x18x128xf32, #tpu.memory_space<any>>) dst(%119 : memref<8x18x128xf32, #tpu.memory_space<vmem>>)
    } else {
    }
    %c0_i32_7 = arith.constant 0 : i32
    %16 = arith.cmpi sgt, %arg1, %c0_i32_7 : i32
    %17 = arith.extui %16 : i1 to i32
    %c0_i32_8 = arith.constant 0 : i32
    %18 = arith.cmpi ne, %17, %c0_i32_8 : i32
    scf.if %18 {
      %c8_i32 = arith.constant 8 : i32
      %116 = arith.muli %arg1, %c8_i32 : i32
      %c1_i32_126 = arith.constant 1 : i32
      %117 = arith.subi %116, %c1_i32_126 : i32
      %c0_i32_127 = arith.constant 0 : i32
      %c0_i32_128 = arith.constant 0 : i32
      %118 = tpu.memref_slice %arg2[%arg0, %117, %c0_i32_127, %c0_i32_128] : memref<2x16x18x128xf32, #tpu.memory_space<any>> -> memref<1x9x18x128xf32, #tpu.memory_space<any>>
      %119 = tpu.memref_squeeze %118 : memref<1x9x18x128xf32, #tpu.memory_space<any>> -> memref<9x18x128xf32, #tpu.memory_space<any>>
      %c0_i32_129 = arith.constant 0 : i32
      %c0_i32_130 = arith.constant 0 : i32
      %c0_i32_131 = arith.constant 0 : i32
      %120 = tpu.memref_slice %arg6[%9, %c0_i32_129, %c0_i32_130, %c0_i32_131] : memref<2x9x18x128xf32, #tpu.memory_space<vmem>> -> memref<1x9x18x128xf32, #tpu.memory_space<vmem>>
      %121 = tpu.memref_squeeze %120 : memref<1x9x18x128xf32, #tpu.memory_space<vmem>> -> memref<9x18x128xf32, #tpu.memory_space<vmem>>
      %122 = tpu.memref_slice %arg7[%9] : memref<2x!tpu.dma_semaphore, #tpu.memory_space<semaphore_mem>> -> memref<1x!tpu.dma_semaphore, #tpu.memory_space<semaphore_mem>>
      %123 = tpu.memref_squeeze %122 : memref<1x!tpu.dma_semaphore, #tpu.memory_space<semaphore_mem>> -> memref<!tpu.dma_semaphore, #tpu.memory_space<semaphore_mem>>
      tpu.wait_dma2 semaphore(%123 : memref<!tpu.dma_semaphore, #tpu.memory_space<semaphore_mem>>) src(%119 : memref<9x18x128xf32, #tpu.memory_space<any>>) dst(%121 : memref<9x18x128xf32, #tpu.memory_space<vmem>>)
    } else {
    }
    %c1_i32_9 = arith.constant 1 : i32
    %19 = arith.addi %arg1, %c1_i32_9 : i32
    %c2_i32_10 = arith.constant 2 : i32
    %20 = arith.cmpi slt, %19, %c2_i32_10 : i32
    %21 = arith.extui %20 : i1 to i32
    %c0_i32_11 = arith.constant 0 : i32
    %22 = arith.cmpi ne, %21, %c0_i32_11 : i32
    scf.if %22 {
      %c1_i32_126 = arith.constant 1 : i32
      %116 = arith.addi %arg1, %c1_i32_126 : i32
      %c1_i32_127 = arith.constant 1 : i32
      %117 = arith.subi %c1_i32_127, %9 : i32
      %c8_i32 = arith.constant 8 : i32
      %118 = arith.muli %116, %c8_i32 : i32
      %c1_i32_128 = arith.constant 1 : i32
      %119 = arith.subi %118, %c1_i32_128 : i32
      %c0_i32_129 = arith.constant 0 : i32
      %c0_i32_130 = arith.constant 0 : i32
      %120 = tpu.memref_slice %arg2[%arg0, %119, %c0_i32_129, %c0_i32_130] : memref<2x16x18x128xf32, #tpu.memory_space<any>> -> memref<1x9x18x128xf32, #tpu.memory_space<any>>
      %121 = tpu.memref_squeeze %120 : memref<1x9x18x128xf32, #tpu.memory_space<any>> -> memref<9x18x128xf32, #tpu.memory_space<any>>
      %c0_i32_131 = arith.constant 0 : i32
      %c0_i32_132 = arith.constant 0 : i32
      %c0_i32_133 = arith.constant 0 : i32
      %122 = tpu.memref_slice %arg6[%117, %c0_i32_131, %c0_i32_132, %c0_i32_133] : memref<2x9x18x128xf32, #tpu.memory_space<vmem>> -> memref<1x9x18x128xf32, #tpu.memory_space<vmem>>
      %123 = tpu.memref_squeeze %122 : memref<1x9x18x128xf32, #tpu.memory_space<vmem>> -> memref<9x18x128xf32, #tpu.memory_space<vmem>>
      %124 = tpu.memref_slice %arg7[%117] : memref<2x!tpu.dma_semaphore, #tpu.memory_space<semaphore_mem>> -> memref<1x!tpu.dma_semaphore, #tpu.memory_space<semaphore_mem>>
      %125 = tpu.memref_squeeze %124 : memref<1x!tpu.dma_semaphore, #tpu.memory_space<semaphore_mem>> -> memref<!tpu.dma_semaphore, #tpu.memory_space<semaphore_mem>>
      tpu.enqueue_dma source(%121 : memref<9x18x128xf32, #tpu.memory_space<any>>) target(%123 : memref<9x18x128xf32, #tpu.memory_space<vmem>>) target_semaphore(%125 : memref<!tpu.dma_semaphore, #tpu.memory_space<semaphore_mem>>)
    } else {
    }
    %cst = arith.constant 0.000000e+00 : f32
    %23 = vector.broadcast %cst : f32 to vector<1x18x128xf32>
    %c0_i32_12 = arith.constant 0 : i32
    %24 = arith.cmpi eq, %arg1, %c0_i32_12 : i32
    %25 = arith.extui %24 : i1 to i32
    %c0_i32_13 = arith.constant 0 : i32
    %26 = arith.cmpi ne, %25, %c0_i32_13 : i32
    scf.if %26 {
      %116 = arith.index_cast %9 : i32 to index
      %c0_126 = arith.constant 0 : index
      %c0_127 = arith.constant 0 : index
      %c0_128 = arith.constant 0 : index
      %117 = vector.load %arg6[%116, %c0_126, %c0_127, %c0_128] : memref<2x9x18x128xf32, #tpu.memory_space<vmem>>, vector<1x1x18x128xf32>
      %118 = vector.shape_cast %117 : vector<1x1x18x128xf32> to vector<1x18x128xf32>
      %119 = vector.shape_cast %23 : vector<1x18x128xf32> to vector<1x1x18x128xf32>
      tpu.vector_store %arg6[%116, %c0_126, %c0_127, %c0_128], %119 {strides = array<i32>} : memref<2x9x18x128xf32, #tpu.memory_space<vmem>>, vector<1x1x18x128xf32>,
    } else {
    }
    %cst_14 = arith.constant 0.000000e+00 : f32
    %27 = vector.broadcast %cst_14 : f32 to vector<32x128xf32>
    %c0_i32_15 = arith.constant 0 : i32
    %c0_i32_16 = arith.constant 0 : i32
    %c0_i32_17 = arith.constant 0 : i32
    %28 = tpu.memref_slice %arg6[%9, %c0_i32_15, %c0_i32_16, %c0_i32_17] : memref<2x9x18x128xf32, #tpu.memory_space<vmem>> -> memref<1x9x18x128xf32, #tpu.memory_space<vmem>>
    %29 = tpu.memref_squeeze %28 : memref<1x9x18x128xf32, #tpu.memory_space<vmem>> -> memref<9x18x128xf32, #tpu.memory_space<vmem>>
    %c0 = arith.constant 0 : index
    %c0_18 = arith.constant 0 : index
    %c0_19 = arith.constant 0 : index
    %30 = tpu.strided_load %29[%c0, %c0_18, %c0_19] {strides = array<i32: 2, 2, 1>} : memref<9x18x128xf32, #tpu.memory_space<vmem>>, vector<4x8x128xf32>
    %31 = vector.shape_cast %30 : vector<4x8x128xf32> to vector<32x128xf32>
    %c0_20 = arith.constant 0 : index
    %c0_21 = arith.constant 0 : index
    %c0_22 = arith.constant 0 : index
    %c0_23 = arith.constant 0 : index
    %32 = vector.load %arg3[%c0_20, %c0_21, %c0_22, %c0_23] : memref<3x3x128x128xf32, #tpu.memory_space<vmem>>, vector<1x1x128x128xf32>
    %33 = vector.shape_cast %32 : vector<1x1x128x128xf32> to vector<128x128xf32>
    %cst_24 = arith.constant dense<0.000000e+00> : vector<32x128xf32>
    %34 = tpu.matmul %31, %33, %cst_24 {dimension_numbers = #tpu.dot_dimension_numbers<[1], [0], [0], [1], [0, 0, 1, 1], [], []>} : vector<32x128xf32>, vector<128x128xf32>, vector<32x128xf32> -> vector<32x128xf32>
    %35 = arith.addf %27, %34 : vector<32x128xf32>
    %c0_i32_25 = arith.constant 0 : i32
    %c0_i32_26 = arith.constant 0 : i32
    %c0_i32_27 = arith.constant 0 : i32
    %36 = tpu.memref_slice %arg6[%9, %c0_i32_25, %c0_i32_26, %c0_i32_27] : memref<2x9x18x128xf32, #tpu.memory_space<vmem>> -> memref<1x9x18x128xf32, #tpu.memory_space<vmem>>
    %37 = tpu.memref_squeeze %36 : memref<1x9x18x128xf32, #tpu.memory_space<vmem>> -> memref<9x18x128xf32, #tpu.memory_space<vmem>>
    %c0_28 = arith.constant 0 : index
    %c1 = arith.constant 1 : index
    %c0_29 = arith.constant 0 : index
    %38 = tpu.strided_load %37[%c0_28, %c1, %c0_29] {strides = array<i32: 2, 2, 1>} : memref<9x18x128xf32, #tpu.memory_space<vmem>>, vector<4x8x128xf32>
    %39 = vector.shape_cast %38 : vector<4x8x128xf32> to vector<32x128xf32>
    %c0_30 = arith.constant 0 : index
    %c1_31 = arith.constant 1 : index
    %c0_32 = arith.constant 0 : index
    %c0_33 = arith.constant 0 : index
    %40 = vector.load %arg3[%c0_30, %c1_31, %c0_32, %c0_33] : memref<3x3x128x128xf32, #tpu.memory_space<vmem>>, vector<1x1x128x128xf32>
    %41 = vector.shape_cast %40 : vector<1x1x128x128xf32> to vector<128x128xf32>
    %cst_34 = arith.constant dense<0.000000e+00> : vector<32x128xf32>
    %42 = tpu.matmul %39, %41, %cst_34 {dimension_numbers = #tpu.dot_dimension_numbers<[1], [0], [0], [1], [0, 0, 1, 1], [], []>} : vector<32x128xf32>, vector<128x128xf32>, vector<32x128xf32> -> vector<32x128xf32>
    %43 = arith.addf %35, %42 : vector<32x128xf32>
    %c0_i32_35 = arith.constant 0 : i32
    %c0_i32_36 = arith.constant 0 : i32
    %c0_i32_37 = arith.constant 0 : i32
    %44 = tpu.memref_slice %arg6[%9, %c0_i32_35, %c0_i32_36, %c0_i32_37] : memref<2x9x18x128xf32, #tpu.memory_space<vmem>> -> memref<1x9x18x128xf32, #tpu.memory_space<vmem>>
    %45 = tpu.memref_squeeze %44 : memref<1x9x18x128xf32, #tpu.memory_space<vmem>> -> memref<9x18x128xf32, #tpu.memory_space<vmem>>
    %c0_38 = arith.constant 0 : index
    %c2 = arith.constant 2 : index
    %c0_39 = arith.constant 0 : index
    %46 = tpu.strided_load %45[%c0_38, %c2, %c0_39] {strides = array<i32: 2, 2, 1>} : memref<9x18x128xf32, #tpu.memory_space<vmem>>, vector<4x8x128xf32>
    %47 = vector.shape_cast %46 : vector<4x8x128xf32> to vector<32x128xf32>
    %c0_40 = arith.constant 0 : index
    %c2_41 = arith.constant 2 : index
    %c0_42 = arith.constant 0 : index
    %c0_43 = arith.constant 0 : index
    %48 = vector.load %arg3[%c0_40, %c2_41, %c0_42, %c0_43] : memref<3x3x128x128xf32, #tpu.memory_space<vmem>>, vector<1x1x128x128xf32>
    %49 = vector.shape_cast %48 : vector<1x1x128x128xf32> to vector<128x128xf32>
    %cst_44 = arith.constant dense<0.000000e+00> : vector<32x128xf32>
    %50 = tpu.matmul %47, %49, %cst_44 {dimension_numbers = #tpu.dot_dimension_numbers<[1], [0], [0], [1], [0, 0, 1, 1], [], []>} : vector<32x128xf32>, vector<128x128xf32>, vector<32x128xf32> -> vector<32x128xf32>
    %51 = arith.addf %43, %50 : vector<32x128xf32>
    %c0_i32_45 = arith.constant 0 : i32
    %c0_i32_46 = arith.constant 0 : i32
    %c0_i32_47 = arith.constant 0 : i32
    %52 = tpu.memref_slice %arg6[%9, %c0_i32_45, %c0_i32_46, %c0_i32_47] : memref<2x9x18x128xf32, #tpu.memory_space<vmem>> -> memref<1x9x18x128xf32, #tpu.memory_space<vmem>>
    %53 = tpu.memref_squeeze %52 : memref<1x9x18x128xf32, #tpu.memory_space<vmem>> -> memref<9x18x128xf32, #tpu.memory_space<vmem>>
    %c1_48 = arith.constant 1 : index
    %c0_49 = arith.constant 0 : index
    %c0_50 = arith.constant 0 : index
    %54 = tpu.strided_load %53[%c1_48, %c0_49, %c0_50] {strides = array<i32: 2, 2, 1>} : memref<9x18x128xf32, #tpu.memory_space<vmem>>, vector<4x8x128xf32>
    %55 = vector.shape_cast %54 : vector<4x8x128xf32> to vector<32x128xf32>
    %c1_51 = arith.constant 1 : index
    %c0_52 = arith.constant 0 : index
    %c0_53 = arith.constant 0 : index
    %c0_54 = arith.constant 0 : index
    %56 = vector.load %arg3[%c1_51, %c0_52, %c0_53, %c0_54] : memref<3x3x128x128xf32, #tpu.memory_space<vmem>>, vector<1x1x128x128xf32>
    %57 = vector.shape_cast %56 : vector<1x1x128x128xf32> to vector<128x128xf32>
    %cst_55 = arith.constant dense<0.000000e+00> : vector<32x128xf32>
    %58 = tpu.matmul %55, %57, %cst_55 {dimension_numbers = #tpu.dot_dimension_numbers<[1], [0], [0], [1], [0, 0, 1, 1], [], []>} : vector<32x128xf32>, vector<128x128xf32>, vector<32x128xf32> -> vector<32x128xf32>
    %59 = arith.addf %51, %58 : vector<32x128xf32>
    %c0_i32_56 = arith.constant 0 : i32
    %c0_i32_57 = arith.constant 0 : i32
    %c0_i32_58 = arith.constant 0 : i32
    %60 = tpu.memref_slice %arg6[%9, %c0_i32_56, %c0_i32_57, %c0_i32_58] : memref<2x9x18x128xf32, #tpu.memory_space<vmem>> -> memref<1x9x18x128xf32, #tpu.memory_space<vmem>>
    %61 = tpu.memref_squeeze %60 : memref<1x9x18x128xf32, #tpu.memory_space<vmem>> -> memref<9x18x128xf32, #tpu.memory_space<vmem>>
    %c1_59 = arith.constant 1 : index
    %c1_60 = arith.constant 1 : index
    %c0_61 = arith.constant 0 : index
    %62 = tpu.strided_load %61[%c1_59, %c1_60, %c0_61] {strides = array<i32: 2, 2, 1>} : memref<9x18x128xf32, #tpu.memory_space<vmem>>, vector<4x8x128xf32>
    %63 = vector.shape_cast %62 : vector<4x8x128xf32> to vector<32x128xf32>
    %c1_62 = arith.constant 1 : index
    %c1_63 = arith.constant 1 : index
    %c0_64 = arith.constant 0 : index
    %c0_65 = arith.constant 0 : index
    %64 = vector.load %arg3[%c1_62, %c1_63, %c0_64, %c0_65] : memref<3x3x128x128xf32, #tpu.memory_space<vmem>>, vector<1x1x128x128xf32>
    %65 = vector.shape_cast %64 : vector<1x1x128x128xf32> to vector<128x128xf32>
    %cst_66 = arith.constant dense<0.000000e+00> : vector<32x128xf32>
    %66 = tpu.matmul %63, %65, %cst_66 {dimension_numbers = #tpu.dot_dimension_numbers<[1], [0], [0], [1], [0, 0, 1, 1], [], []>} : vector<32x128xf32>, vector<128x128xf32>, vector<32x128xf32> -> vector<32x128xf32>
    %67 = arith.addf %59, %66 : vector<32x128xf32>
    %c0_i32_67 = arith.constant 0 : i32
    %c0_i32_68 = arith.constant 0 : i32
    %c0_i32_69 = arith.constant 0 : i32
    %68 = tpu.memref_slice %arg6[%9, %c0_i32_67, %c0_i32_68, %c0_i32_69] : memref<2x9x18x128xf32, #tpu.memory_space<vmem>> -> memref<1x9x18x128xf32, #tpu.memory_space<vmem>>
    %69 = tpu.memref_squeeze %68 : memref<1x9x18x128xf32, #tpu.memory_space<vmem>> -> memref<9x18x128xf32, #tpu.memory_space<vmem>>
    %c1_70 = arith.constant 1 : index
    %c2_71 = arith.constant 2 : index
    %c0_72 = arith.constant 0 : index
    %70 = tpu.strided_load %69[%c1_70, %c2_71, %c0_72] {strides = array<i32: 2, 2, 1>} : memref<9x18x128xf32, #tpu.memory_space<vmem>>, vector<4x8x128xf32>
    %71 = vector.shape_cast %70 : vector<4x8x128xf32> to vector<32x128xf32>
    %c1_73 = arith.constant 1 : index
    %c2_74 = arith.constant 2 : index
    %c0_75 = arith.constant 0 : index
    %c0_76 = arith.constant 0 : index
    %72 = vector.load %arg3[%c1_73, %c2_74, %c0_75, %c0_76] : memref<3x3x128x128xf32, #tpu.memory_space<vmem>>, vector<1x1x128x128xf32>
    %73 = vector.shape_cast %72 : vector<1x1x128x128xf32> to vector<128x128xf32>
    %cst_77 = arith.constant dense<0.000000e+00> : vector<32x128xf32>
    %74 = tpu.matmul %71, %73, %cst_77 {dimension_numbers = #tpu.dot_dimension_numbers<[1], [0], [0], [1], [0, 0, 1, 1], [], []>} : vector<32x128xf32>, vector<128x128xf32>, vector<32x128xf32> -> vector<32x128xf32>
    %75 = arith.addf %67, %74 : vector<32x128xf32>
    %c0_i32_78 = arith.constant 0 : i32
    %c0_i32_79 = arith.constant 0 : i32
    %c0_i32_80 = arith.constant 0 : i32
    %76 = tpu.memref_slice %arg6[%9, %c0_i32_78, %c0_i32_79, %c0_i32_80] : memref<2x9x18x128xf32, #tpu.memory_space<vmem>> -> memref<1x9x18x128xf32, #tpu.memory_space<vmem>>
    %77 = tpu.memref_squeeze %76 : memref<1x9x18x128xf32, #tpu.memory_space<vmem>> -> memref<9x18x128xf32, #tpu.memory_space<vmem>>
    %c2_81 = arith.constant 2 : index
    %c0_82 = arith.constant 0 : index
    %c0_83 = arith.constant 0 : index
    %78 = tpu.strided_load %77[%c2_81, %c0_82, %c0_83] {strides = array<i32: 2, 2, 1>} : memref<9x18x128xf32, #tpu.memory_space<vmem>>, vector<4x8x128xf32>
    %79 = vector.shape_cast %78 : vector<4x8x128xf32> to vector<32x128xf32>
    %c2_84 = arith.constant 2 : index
    %c0_85 = arith.constant 0 : index
    %c0_86 = arith.constant 0 : index
    %c0_87 = arith.constant 0 : index
    %80 = vector.load %arg3[%c2_84, %c0_85, %c0_86, %c0_87] : memref<3x3x128x128xf32, #tpu.memory_space<vmem>>, vector<1x1x128x128xf32>
    %81 = vector.shape_cast %80 : vector<1x1x128x128xf32> to vector<128x128xf32>
    %cst_88 = arith.constant dense<0.000000e+00> : vector<32x128xf32>
    %82 = tpu.matmul %79, %81, %cst_88 {dimension_numbers = #tpu.dot_dimension_numbers<[1], [0], [0], [1], [0, 0, 1, 1], [], []>} : vector<32x128xf32>, vector<128x128xf32>, vector<32x128xf32> -> vector<32x128xf32>
    %83 = arith.addf %75, %82 : vector<32x128xf32>
    %c0_i32_89 = arith.constant 0 : i32
    %c0_i32_90 = arith.constant 0 : i32
    %c0_i32_91 = arith.constant 0 : i32
    %84 = tpu.memref_slice %arg6[%9, %c0_i32_89, %c0_i32_90, %c0_i32_91] : memref<2x9x18x128xf32, #tpu.memory_space<vmem>> -> memref<1x9x18x128xf32, #tpu.memory_space<vmem>>
    %85 = tpu.memref_squeeze %84 : memref<1x9x18x128xf32, #tpu.memory_space<vmem>> -> memref<9x18x128xf32, #tpu.memory_space<vmem>>
    %c2_92 = arith.constant 2 : index
    %c1_93 = arith.constant 1 : index
    %c0_94 = arith.constant 0 : index
    %86 = tpu.strided_load %85[%c2_92, %c1_93, %c0_94] {strides = array<i32: 2, 2, 1>} : memref<9x18x128xf32, #tpu.memory_space<vmem>>, vector<4x8x128xf32>
    %87 = vector.shape_cast %86 : vector<4x8x128xf32> to vector<32x128xf32>
    %c2_95 = arith.constant 2 : index
    %c1_96 = arith.constant 1 : index
    %c0_97 = arith.constant 0 : index
    %c0_98 = arith.constant 0 : index
    %88 = vector.load %arg3[%c2_95, %c1_96, %c0_97, %c0_98] : memref<3x3x128x128xf32, #tpu.memory_space<vmem>>, vector<1x1x128x128xf32>
    %89 = vector.shape_cast %88 : vector<1x1x128x128xf32> to vector<128x128xf32>
    %cst_99 = arith.constant dense<0.000000e+00> : vector<32x128xf32>
    %90 = tpu.matmul %87, %89, %cst_99 {dimension_numbers = #tpu.dot_dimension_numbers<[1], [0], [0], [1], [0, 0, 1, 1], [], []>} : vector<32x128xf32>, vector<128x128xf32>, vector<32x128xf32> -> vector<32x128xf32>
    %91 = arith.addf %83, %90 : vector<32x128xf32>
    %c0_i32_100 = arith.constant 0 : i32
    %c0_i32_101 = arith.constant 0 : i32
    %c0_i32_102 = arith.constant 0 : i32
    %92 = tpu.memref_slice %arg6[%9, %c0_i32_100, %c0_i32_101, %c0_i32_102] : memref<2x9x18x128xf32, #tpu.memory_space<vmem>> -> memref<1x9x18x128xf32, #tpu.memory_space<vmem>>
    %93 = tpu.memref_squeeze %92 : memref<1x9x18x128xf32, #tpu.memory_space<vmem>> -> memref<9x18x128xf32, #tpu.memory_space<vmem>>
    %c2_103 = arith.constant 2 : index
    %c2_104 = arith.constant 2 : index
    %c0_105 = arith.constant 0 : index
    %94 = tpu.strided_load %93[%c2_103, %c2_104, %c0_105] {strides = array<i32: 2, 2, 1>} : memref<9x18x128xf32, #tpu.memory_space<vmem>>, vector<4x8x128xf32>
    %95 = vector.shape_cast %94 : vector<4x8x128xf32> to vector<32x128xf32>
    %c2_106 = arith.constant 2 : index
    %c2_107 = arith.constant 2 : index
    %c0_108 = arith.constant 0 : index
    %c0_109 = arith.constant 0 : index
    %96 = vector.load %arg3[%c2_106, %c2_107, %c0_108, %c0_109] : memref<3x3x128x128xf32, #tpu.memory_space<vmem>>, vector<1x1x128x128xf32>
    %97 = vector.shape_cast %96 : vector<1x1x128x128xf32> to vector<128x128xf32>
    %cst_110 = arith.constant dense<0.000000e+00> : vector<32x128xf32>
    %98 = tpu.matmul %95, %97, %cst_110 {dimension_numbers = #tpu.dot_dimension_numbers<[1], [0], [0], [1], [0, 0, 1, 1], [], []>} : vector<32x128xf32>, vector<128x128xf32>, vector<32x128xf32> -> vector<32x128xf32>
    %99 = arith.addf %91, %98 : vector<32x128xf32>
    %c0_111 = arith.constant 0 : index
    %c0_112 = arith.constant 0 : index
    %100 = vector.load %arg4[%c0_111, %c0_112] : memref<1x128xf32, #tpu.memory_space<vmem>>, vector<1x128xf32>
    %101 = vector.broadcast %100 : vector<1x128xf32> to vector<32x128xf32>
    %102 = arith.addf %99, %101 : vector<32x128xf32>
    %cst_113 = arith.constant 0.000000e+00 : f32
    %103 = vector.broadcast %cst_113 : f32 to vector<32x128xf32>
    %104 = arith.maximumf %102, %103 : vector<32x128xf32>
    %105 = vector.shape_cast %104 : vector<32x128xf32> to vector<4x8x128xf32>
    %cst_114 = arith.constant 0.000000e+00 : f32
    %106 = vector.broadcast %cst_114 : f32 to vector<4x1x128xf32>
    %c0_115 = arith.constant 0 : index
    %c0_116 = arith.constant 0 : index
    %c1_117 = arith.constant 1 : index
    %c0_118 = arith.constant 0 : index
    %107 = vector.load %arg5[%c0_115, %c0_116, %c1_117, %c0_118] : memref<1x4x10x128xf32, #tpu.memory_space<vmem>>, vector<1x4x8x128xf32>
    %108 = vector.shape_cast %107 : vector<1x4x8x128xf32> to vector<4x8x128xf32>
    %109 = vector.shape_cast %105 : vector<4x8x128xf32> to vector<1x4x8x128xf32>
    tpu.vector_store %arg5[%c0_115, %c0_116, %c1_117, %c0_118], %109 {strides = array<i32>} : memref<1x4x10x128xf32, #tpu.memory_space<vmem>>, vector<1x4x8x128xf32>,
    %c0_119 = arith.constant 0 : index
    %c0_120 = arith.constant 0 : index
    %c0_121 = arith.constant 0 : index
    %c0_122 = arith.constant 0 : index
    %110 = vector.load %arg5[%c0_119, %c0_120, %c0_121, %c0_122] : memref<1x4x10x128xf32, #tpu.memory_space<vmem>>, vector<1x4x1x128xf32>
    %111 = vector.shape_cast %110 : vector<1x4x1x128xf32> to vector<4x1x128xf32>
    %112 = vector.shape_cast %106 : vector<4x1x128xf32> to vector<1x4x1x128xf32>
    tpu.vector_store %arg5[%c0_119, %c0_120, %c0_121, %c0_122], %112 {strides = array<i32>} : memref<1x4x10x128xf32, #tpu.memory_space<vmem>>, vector<1x4x1x128xf32>,
    %c0_123 = arith.constant 0 : index
    %c0_124 = arith.constant 0 : index
    %c9 = arith.constant 9 : index
    %c0_125 = arith.constant 0 : index
    %113 = vector.load %arg5[%c0_123, %c0_124, %c9, %c0_125] : memref<1x4x10x128xf32, #tpu.memory_space<vmem>>, vector<1x4x1x128xf32>
    %114 = vector.shape_cast %113 : vector<1x4x1x128xf32> to vector<4x1x128xf32>
    %115 = vector.shape_cast %106 : vector<4x1x128xf32> to vector<1x4x1x128xf32>
    tpu.vector_store %arg5[%c0_123, %c0_124, %c9, %c0_125], %115 {strides = array<i32>} : memref<1x4x10x128xf32, #tpu.memory_space<vmem>>, vector<1x4x1x128xf32>,
    return
  }
  func.func @transform_1(%arg0: i32, %arg1: i32) -> (i32, i32, i32, i32) {
    %c0_i32 = arith.constant 0 : i32
    %c0_i32_0 = arith.constant 0 : i32
    %c0_i32_1 = arith.constant 0 : i32
    %c0_i32_2 = arith.constant 0 : i32
    %c0_i32_3 = arith.constant 0 : i32
    return %c0_i32, %c0_i32_0, %c0_i32_1, %c0_i32_2 : i32, i32, i32, i32
  }
  func.func @transform_2(%arg0: i32, %arg1: i32) -> (i32, i32) {
    %c0_i32 = arith.constant 0 : i32
    %c0_i32_0 = arith.constant 0 : i32
    %c0_i32_1 = arith.constant 0 : i32
    return %c0_i32, %c0_i32_0 : i32, i32
  }
  func.func @transform_3(%arg0: i32, %arg1: i32) -> (i32, i32, i32, i32) {
    %c0_i32 = arith.constant 0 : i32
    %c0_i32_0 = arith.constant 0 : i32
    %c0_i32_1 = arith.constant 0 : i32
    return %arg0, %arg1, %c0_i32, %c0_i32_0 : i32, i32, i32, i32
  }
}

</mosaic_0001>

<bundles_post_ra>
// kernel: tpu_custom_call.1
= control target key start
LH: loop header
LB: loop body
LE: loop exit
PB: predicated region body
PF: predicated region fallthrough
CT: control target
= control target key end

     0   :  { %s2562_s12 = smov 0   ;;  %s2564_s13 = smov 0   ;;  %s3245_s0 = inlined_call_operand.vmem [shape: f32[2,16,18,128], index: 0, kind: input, shape index: {}]   ;;  %s3246_s1 = inlined_call_operand.vmem [shape: f32[3,3,128,128], index: 1, kind: input, shape index: {}]   ;;  %s3247_s2 = inlined_call_operand.vmem [shape: f32[1,128], index: 2, kind: input, shape index: {}]   ;;  %s3248_s3 = inlined_call_operand.vmem [shape: f32[2,8,10,128], index: 3, kind: output, shape index: {}]  }
   0x1   :  { %s2566_s14 = smov 0   ;;  %s2568_s15 = smov 0  }
   0x2   :  { %s2570_s16 = smov 0  }
   0x3 LB: > { %s22_s17 = sadd.s32 1, %s2530_s14  ;;  %s25_s18 = sadd.s32 1, %s2534_s15  ;;  %s2538_s16 = sphi %s2570_s16, %s13_s16   ;;  %s2534_s15 = sphi %s2568_s15, %s3252_s15   ;;  %s2530_s14 = sphi %s2566_s14, %s3251_s14   ;;  %s2526_s13 = sphi %s2564_s13, %s3250_s13   ;;  %s2522_s12 = sphi %s2562_s12, %s3249_s12  }
   0x4   : > { %p23_p0 = scmp.ge.s32.totalorder %s22_s17, 2  ;;  %p1652_p1 = scmp.ge.s32.totalorder %s2538_s16, 1 }
   0x5   : > { %p117_p2 = scmp.lt.s32.totalorder %s2538_s16, 5 }
   0x6   : > { %s3254_s17 = smov (%p23_p0, %s22_s17), 0  ;;  %s3256_s18 = smov (!%p23_p0, %s25_s18), %s2534_s15 }
   0x7   : > { %p118_p3 = pnand %p1652_p1, %p117_p2  ;;  %p27_p4 = scmp.ge.s32.totalorder %s3256_s18, 2 }
   0x8   : > { %s1653_s19 = sshll.u32 (!%p118_p3), %s2522_s12, 2  ;;  %p140_p5 = scmp.lt.s32.totalorder (!%p118_p3), %s2526_s13, 1 }
   0x9   : > { %s3258_s18 = smov (%p27_p4, %s3256_s18), 0  ;;  %121 = sbr.rel (%p118_p3) target bundleno = 461 (0x1cd), region = 28 }
   0xa   : > { %p142_p6 = scmp.lt.s32.totalorder (!%p118_p3), %s1653_s19, 7  ;;  %p150_p7 = scmp.lt.s32.totalorder (!%p118_p3), %s2522_s12, 0 }
   0xb   : > { %s151_s22 = ssub.s32 (!%p118_p3), 0, %s2522_s12  ;;  %p1660_p9 = scmp.ne.s32.totalorder (!%p118_p3), %s2522_s12, 0 }
   0xc   : > { %s1657_s24 = smin.u32 (!%p118_p3), %s2522_s12, %s151_s22 }
   0xd   : > { %s153_s26 = sand.u32 (!%p118_p3), 1, %s1657_s24  }
   0xe   : > { %s141_s20 = scalar_select %p140_p5, %s2526_s13, 1 }
   0xf   : > { %s3260_s19 = smov (!%p142_p6, %s1653_s19), 7  ;;  %s154_s28 = ssub.s32 0, %s153_s26 }
  0x10   : > { %s1655_s21 = sshll.u32 %s141_s20, 4  ;;  %s1654_s23 = sshll.u32 %s3260_s19, 1 }
  0x11   : > { %s146_s25 = sadd.s32 %s1655_s21, %s1654_s23  ;;  %s3262_s28 = smov (!%p150_p7, %s154_s28), %s153_s26 }
  0x12   : > { %s1656_s27 = sshll.u32 %s146_s25, 3  ;;  %p1659_p8 = scmp.lt.s32.totalorder %s3262_s28, 0 }
  0x13   : > { %s2605_s4 = scalar_lea.vmem %s3248_s3, %s1656_s27  ;;  %s160_s5 = sadd.s32 2, %s3262_s28 }
  0x14   : > { %s3264_s5 = smov (!%p1659_p8, %s160_s5), %s3262_s28  ;;  %165 = sbr.rel (%p1660_p9) target bundleno = 42 (0x2a), region = 32 }
  0x15   : > { %s166_s6 = smul.u32 (!%p1660_p9), 384, %s2526_s13  ;;  %s171_s19 = scalar_lea.sflag (!%p1660_p9), [#allocation3], %s3264_s5 }
  0x16   : > { %s1546_s7 = smul.u32 (!%p1660_p9), 216, %s3264_s5 }
  0x17   : > { %s2617_s10 = scalar_lea.vmem (!%p1660_p9), %s3245_s0, %s166_s6 }
  0x18   : > { %s2622_s11 = scalar_lea.vmem (!%p1660_p9), [#allocation2], %s1546_s7 }
  0x19   : > { %v224_v0 = vld [vmem:[%s2617_s10] sm:$0xff]  ;;  %v226_v1 = vld [vmem:[%s2617_s10 + $0x8] sm:$0xff]  ;;  %v228_v2 = vld [vmem:[%s2617_s10 + $0x18] sm:$0xff] }
  0x1a   : > { %1662 = vst [vmem:[%s2622_s11 + $0x18] sm:$0xff] %v224_v0  ;;  %1663 = vst [vmem:[%s2622_s11 + $0x20] sm:$0xff] %v226_v1  ;;  %v230_v3 = vld [vmem:[%s2617_s10 + $0x20] sm:$0xff]  ;;  %v232_v4 = vld [vmem:[%s2617_s10 + $0x30] sm:$0xff] }
  0x1b   : > { %1664 = vst [vmem:[%s2622_s11 + $0x30] sm:$0xff] %v228_v2  ;;  %v234_v5 = vld [vmem:[%s2617_s10 + $0x38] sm:$0xff]  ;;  %1665 = vst [vmem:[%s2622_s11 + $0x38] sm:$0xff] %v230_v3  ;;  %v236_v6 = vld [vmem:[%s2617_s10 + $0x48] sm:$0xff] }
  0x1c   : > { %1666 = vst [vmem:[%s2622_s11 + $0x48] sm:$0xff] %v232_v4  ;;  %1667 = vst [vmem:[%s2622_s11 + $0x50] sm:$0xff] %v234_v5  ;;  %v238_v7 = vld [vmem:[%s2617_s10 + $0x50] sm:$0xff]  ;;  %v240_v8 = vld [vmem:[%s2617_s10 + $0x60] sm:$0xff] }
  0x1d   : > { %1668 = vst [vmem:[%s2622_s11 + $0x60] sm:$0xff] %v236_v6  ;;  %1669 = vst [vmem:[%s2622_s11 + $0x68] sm:$0xff] %v238_v7  ;;  %v242_v9 = vld [vmem:[%s2617_s10 + $0x68] sm:$0xff]  ;;  %v244_v10 = vld [vmem:[%s2617_s10 + $0x78] sm:$0xff] }
  0x1e   : > { %1670 = vst [vmem:[%s2622_s11 + $0x78] sm:$0xff] %v240_v8  ;;  %v246_v11 = vld [vmem:[%s2617_s10 + $0x80] sm:$0xff]  ;;  %1671 = vst [vmem:[%s2622_s11 + $0x80] sm:$0xff] %v242_v9  ;;  %v248_v12 = vld [vmem:[%s2617_s10 + $0x90] sm:$0xff] }
  0x1f   : > { %1672 = vst [vmem:[%s2622_s11 + $0x90] sm:$0xff] %v244_v10  ;;  %1673 = vst [vmem:[%s2622_s11 + $0x98] sm:$0xff] %v246_v11  ;;  %v250_v13 = vld [vmem:[%s2617_s10 + $0x98] sm:$0xff]  ;;  %v252_v14 = vld [vmem:[%s2617_s10 + $0xa8] sm:$0xff] }
  0x20   : > { %1674 = vst [vmem:[%s2622_s11 + $0xa8] sm:$0xff] %v248_v12  ;;  %1675 = vst [vmem:[%s2622_s11 + $0xb0] sm:$0xff] %v250_v13  ;;  %v254_v15 = vld [vmem:[%s2617_s10 + $0xb0] sm:$0xff]  ;;  %v1680_v17 = vld [vmem:[%s2617_s10 + $0x28] sm:$0x3] }
  0x21   : > { %1676 = vst [vmem:[%s2622_s11 + $0xc0] sm:$0xff] %v252_v14  ;;  %v1678_v16 = vld [vmem:[%s2617_s10 + $0x10] sm:$0x3]  ;;  %1677 = vst [vmem:[%s2622_s11 + $0xc8] sm:$0xff] %v254_v15  ;;  %v1682_v18 = vld [vmem:[%s2617_s10 + $0x40] sm:$0x3] }
  0x22   : > { %1679 = vst [vmem:[%s2622_s11 + $0x28] sm:$0x3] %v1678_v16  ;;  %1681 = vst [vmem:[%s2622_s11 + $0x40] sm:$0x3] %v1680_v17  ;;  %v1684_v19 = vld [vmem:[%s2617_s10 + $0x58] sm:$0x3] }
  0x23   : > { %v1686_v20 = vld [vmem:[%s2617_s10 + $0x70] sm:$0x3]  ;;  %1683 = vst [vmem:[%s2622_s11 + $0x58] sm:$0x3] %v1682_v18  ;;  %1685 = vst [vmem:[%s2622_s11 + $0x70] sm:$0x3] %v1684_v19 }
  0x24   : > { %1687 = vst [vmem:[%s2622_s11 + $0x88] sm:$0x3] %v1686_v20  ;;  %v1688_v21 = vld [vmem:[%s2617_s10 + $0x88] sm:$0x3]  ;;  %v1690_v22 = vld [vmem:[%s2617_s10 + $0xa0] sm:$0x3] }
  0x25   : > { %v1692_v23 = vld [vmem:[%s2617_s10 + $0xb8] sm:$0x3]  ;;  %1689 = vst [vmem:[%s2622_s11 + $0xa0] sm:$0x3] %v1688_v21  ;;  %1691 = vst [vmem:[%s2622_s11 + $0xb8] sm:$0x3] %v1690_v22 }
  0x26   : > { %1693 = vst [vmem:[%s2622_s11 + $0xd0] sm:$0x3] %v1692_v23 }
  0x27   : > { %285 = vsyncadd %s171_s19, 2304 }
  0x28   : > { %2514 = dma.done.wait %s171_s19, 2304 }
  0x29   : > { %2515 = vsyncadd %s171_s19, 4294964992 }
  0x2a PF: > { %p2451_p10 = scmp.gt.s32.totalorder %s2522_s12, 0  ;;  %s294_s20 = scalar_lea.sflag [#allocation3], %s3264_s5 }
  0x2c   : > { %2517 = dma.done.wait (%p2451_p10), %s294_s20, 2592 }
  0x2d   : > { %2519 = vsyncadd (%p2451_p10), %s294_s20, 4294964704  ;;  %s299_s21 = sadd.s32 1, %s2522_s12 }
  0x2e   : > { %p1703_p11 = scmp.ge.s32.totalorder %s299_s21, 2 }
  0x2f   : > { %s304_s22 = ssub.s32 (!%p1703_p11), 1, %s3264_s5  ;;  %s1893_s23 = sshll.u32 (!%p1703_p11), %s2522_s12, 3 }
  0x30   : > { %303 = sbr.rel (%p1703_p11) target bundleno = 72 (0x48), region = 77  ;;  %s1894_s24 = sadd.s32 (!%p1703_p11), 8, %s1893_s23 }
  0x31   : > { %s308_s25 = smul.u32 (!%p1703_p11), 384, %s2526_s13  ;;  %s1705_s26 = sadd.s32 (!%p1703_p11), 4294967295, %s1894_s24 }
  0x32   : > { %s311_s27 = smul.u32 (!%p1703_p11), 216, %s304_s22  ;;  %s313_s8 = scalar_lea.sflag (!%p1703_p11), [#allocation3], %s304_s22 }
  0x33   : > { %s307_s28 = smul.u32 (!%p1703_p11), 24, %s1705_s26 }
  0x34   : > { %s2686_s13 = scalar_lea.vmem (!%p1703_p11), [#allocation2], %s311_s27 }
  0x35   : > { %s309_s29 = sadd.s32 %s308_s25, %s307_s28 }
  0x36   : > { %s2681_s7 = scalar_lea.vmem %s3245_s0, %s309_s29 }
  0x37   : > { %v368_v24 = vld [vmem:[%s2681_s7] sm:$0xff]  ;;  %v370_v25 = vld [vmem:[%s2681_s7 + $0x8] sm:$0xff]  ;;  %v372_v26 = vld [vmem:[%s2681_s7 + $0x18] sm:$0xff] }
  0x38   : > { %369 = vst [vmem:[%s2686_s13] sm:$0xff] %v368_v24  ;;  %371 = vst [vmem:[%s2686_s13 + $0x8] sm:$0xff] %v370_v25  ;;  %v374_v27 = vld [vmem:[%s2681_s7 + $0x20] sm:$0xff]  ;;  %v376_v28 = vld [vmem:[%s2681_s7 + $0x30] sm:$0xff] }
  0x39   : > { %373 = vst [vmem:[%s2686_s13 + $0x18] sm:$0xff] %v372_v26  ;;  %v378_v29 = vld [vmem:[%s2681_s7 + $0x38] sm:$0xff]  ;;  %375 = vst [vmem:[%s2686_s13 + $0x20] sm:$0xff] %v374_v27  ;;  %v380_v30 = vld [vmem:[%s2681_s7 + $0x48] sm:$0xff] }
  0x3a   : > { %377 = vst [vmem:[%s2686_s13 + $0x30] sm:$0xff] %v376_v28  ;;  %379 = vst [vmem:[%s2686_s13 + $0x38] sm:$0xff] %v378_v29  ;;  %v382_v31 = vld [vmem:[%s2681_s7 + $0x50] sm:$0xff]  ;;  %v384_v32 = vld [vmem:[%s2681_s7 + $0x60] sm:$0xff] }
  0x3b   : > { %381 = vst [vmem:[%s2686_s13 + $0x48] sm:$0xff] %v380_v30  ;;  %383 = vst [vmem:[%s2686_s13 + $0x50] sm:$0xff] %v382_v31  ;;  %v386_v33 = vld [vmem:[%s2681_s7 + $0x68] sm:$0xff]  ;;  %v388_v34 = vld [vmem:[%s2681_s7 + $0x78] sm:$0xff] }
  0x3c   : > { %385 = vst [vmem:[%s2686_s13 + $0x60] sm:$0xff] %v384_v32  ;;  %v390_v35 = vld [vmem:[%s2681_s7 + $0x80] sm:$0xff]  ;;  %387 = vst [vmem:[%s2686_s13 + $0x68] sm:$0xff] %v386_v33  ;;  %v392_v36 = vld [vmem:[%s2681_s7 + $0x90] sm:$0xff] }
  0x3d   : > { %389 = vst [vmem:[%s2686_s13 + $0x78] sm:$0xff] %v388_v34  ;;  %391 = vst [vmem:[%s2686_s13 + $0x80] sm:$0xff] %v390_v35  ;;  %v394_v37 = vld [vmem:[%s2681_s7 + $0x98] sm:$0xff]  ;;  %v396_v38 = vld [vmem:[%s2681_s7 + $0xa8] sm:$0xff] }
  0x3e   : > { %393 = vst [vmem:[%s2686_s13 + $0x90] sm:$0xff] %v392_v36  ;;  %395 = vst [vmem:[%s2686_s13 + $0x98] sm:$0xff] %v394_v37  ;;  %v398_v39 = vld [vmem:[%s2681_s7 + $0xb0] sm:$0xff]  ;;  %v400_v40 = vld [vmem:[%s2681_s7 + $0xc0] sm:$0xff] }
  0x3f   : > { %397 = vst [vmem:[%s2686_s13 + $0xa8] sm:$0xff] %v396_v38  ;;  %v402_v41 = vld [vmem:[%s2681_s7 + $0xc8] sm:$0xff]  ;;  %399 = vst [vmem:[%s2686_s13 + $0xb0] sm:$0xff] %v398_v39  ;;  %v1706_v42 = vld [vmem:[%s2681_s7 + $0x10] sm:$0x3] }
  0x40   : > { %401 = vst [vmem:[%s2686_s13 + $0xc0] sm:$0xff] %v400_v40  ;;  %403 = vst [vmem:[%s2686_s13 + $0xc8] sm:$0xff] %v402_v41  ;;  %v1708_v43 = vld [vmem:[%s2681_s7 + $0x28] sm:$0x3]  ;;  %v1710_v44 = vld [vmem:[%s2681_s7 + $0x40] sm:$0x3] }
  0x41   : > { %1707 = vst [vmem:[%s2686_s13 + $0x10] sm:$0x3] %v1706_v42  ;;  %1709 = vst [vmem:[%s2686_s13 + $0x28] sm:$0x3] %v1708_v43  ;;  %v1712_v45 = vld [vmem:[%s2681_s7 + $0x58] sm:$0x3] }
  0x42   : > { %1711 = vst [vmem:[%s2686_s13 + $0x40] sm:$0x3] %v1710_v44  ;;  %v1714_v46 = vld [vmem:[%s2681_s7 + $0x70] sm:$0x3]  ;;  %v1716_v47 = vld [vmem:[%s2681_s7 + $0x88] sm:$0x3] }
  0x43   : > { %1713 = vst [vmem:[%s2686_s13 + $0x58] sm:$0x3] %v1712_v45  ;;  %1715 = vst [vmem:[%s2686_s13 + $0x70] sm:$0x3] %v1714_v46  ;;  %v1718_v48 = vld [vmem:[%s2681_s7 + $0xa0] sm:$0x3] }
  0x44   : > { %1717 = vst [vmem:[%s2686_s13 + $0x88] sm:$0x3] %v1716_v47  ;;  %v1720_v49 = vld [vmem:[%s2681_s7 + $0xb8] sm:$0x3]  ;;  %v1722_v50 = vld [vmem:[%s2681_s7 + $0xd0] sm:$0x3] }
  0x45   : > { %1719 = vst [vmem:[%s2686_s13 + $0xa0] sm:$0x3] %v1718_v48  ;;  %1721 = vst [vmem:[%s2686_s13 + $0xb8] sm:$0x3] %v1720_v49 }
  0x46   : > { %1723 = vst [vmem:[%s2686_s13 + $0xd0] sm:$0x3] %v1722_v50 }
  0x47   : > { %435 = vsyncadd %s313_s8, 2592 }
  0x48 PF: > { %438 = sbr.rel (%p1660_p9) target bundleno = 80 (0x50), region = 118 }
  0x49   : > { %s439_s9 = smul.u32 (!%p1660_p9), 216, %s3264_s5 }
  0x4b   : > { %s440_s10 = scalar_lea.vmem (!%p1660_p9), [#allocation2], %s439_s9 }
  0x4d   : > { %v2540_v51 = vmov 0.0  }
  0x4e   : > { %441 = vst [vmem:[%s440_s10] sm:$0xff] %v2540_v51  ;;  %442 = vst [vmem:[%s440_s10 + $0x8] sm:$0xff] %v2540_v51 }
  0x4f   : > { %443 = vst [vmem:[%s440_s10 + $0x10] sm:$0x3] %v2540_v51 }
  0x50 PF: > { %v1747_v52 = vld [vmem:[%s3246_s1 + $0xf8] sm:$0xff]  ;;  %v1746_v54 = vld [vmem:[%s3246_s1 + $0xf0] sm:$0xff]  ;;  %v1745_v56 = vld [vmem:[%s3246_s1 + $0xe8] sm:$0xff]  ;;  %s444_s29 = smul.u32 216, %s3264_s5 }
  0x51   : > { %v468_v53 = vld [vmem:[%s3246_s1 + $0x78] sm:$0xff]  ;;  %2075 = vmatprep.subr.mxu0 %v1747_v52  ;;  %v467_v55 = vld [vmem:[%s3246_s1 + $0x70] sm:$0xff]  ;;  %v466_v57 = vld [vmem:[%s3246_s1 + $0x68] sm:$0xff] }
  0x52   : > { %2113 = vmatprep.subr.mxu1 %v468_v53  ;;  %2076 = vmatpush3.msra.mxu0 %v1747_v52  ;;  %v1744_v58 = vld [vmem:[%s3246_s1 + $0xe0] sm:$0xff]  ;;  %v1743_v60 = vld [vmem:[%s3246_s1 + $0xd8] sm:$0xff]  ;;  %v1742_v62 = vld [vmem:[%s3246_s1 + $0xd0] sm:$0xff]  ;;  %s2841_s22 = scalar_lea.vmem [#allocation2], %s444_s29 }
  0x53   : > { %2114 = vmatpush3.msra.mxu1 %v468_v53  ;;  %2077 = vmatprep.subr.mxu0 %v1746_v54  ;;  %v465_v59 = vld [vmem:[%s3246_s1 + $0x60] sm:$0xff]  ;;  %v464_v61 = vld [vmem:[%s3246_s1 + $0x58] sm:$0xff]  ;;  %v463_v63 = vld [vmem:[%s3246_s1 + $0x50] sm:$0xff] }
  0x54   : > { %2115 = vmatprep.subr.mxu1 %v467_v55  ;;  %2078 = vmatpush3.msra.mxu0 %v1746_v54  ;;  %v1741_v0 = vld [vmem:[%s3246_s1 + $0xc8] sm:$0xff]  ;;  %v1740_v2 = vld [vmem:[%s3246_s1 + $0xc0] sm:$0xff]  ;;  %v1739_v4 = vld [vmem:[%s3246_s1 + $0xb8] sm:$0xff] }
  0x55   : > { %2116 = vmatpush3.msra.mxu1 %v467_v55  ;;  %2079 = vmatprep.subr.mxu0 %v1745_v56  ;;  %v462_v1 = vld [vmem:[%s3246_s1 + $0x48] sm:$0xff]  ;;  %v461_v3 = vld [vmem:[%s3246_s1 + $0x40] sm:$0xff]  ;;  %v460_v5 = vld [vmem:[%s3246_s1 + $0x38] sm:$0xff] }
  0x56   : > { %2117 = vmatprep.subr.mxu1 %v466_v57  ;;  %2080 = vmatpush3.msra.mxu0 %v1745_v56  ;;  %v1738_v6 = vld [vmem:[%s3246_s1 + $0xb0] sm:$0xff]  ;;  %v1737_v8 = vld [vmem:[%s3246_s1 + $0xa8] sm:$0xff]  ;;  %v1736_v10 = vld [vmem:[%s3246_s1 + $0xa0] sm:$0xff] }
  0x57   : > { %2118 = vmatpush3.msra.mxu1 %v466_v57  ;;  %2081 = vmatprep.subr.mxu0 %v1744_v58  ;;  %v459_v7 = vld [vmem:[%s3246_s1 + $0x30] sm:$0xff]  ;;  %v458_v9 = vld [vmem:[%s3246_s1 + $0x28] sm:$0xff]  ;;  %v457_v11 = vld [vmem:[%s3246_s1 + $0x20] sm:$0xff] }
  0x58   : > { %2119 = vmatprep.subr.mxu1 %v465_v59  ;;  %2082 = vmatpush3.msra.mxu0 %v1744_v58  ;;  %v1735_v12 = vld [vmem:[%s3246_s1 + $0x98] sm:$0xff]  ;;  %v1734_v14 = vld [vmem:[%s3246_s1 + $0x90] sm:$0xff]  ;;  %v1733_v16 = vld [vmem:[%s3246_s1 + $0x88] sm:$0xff] }
  0x59   : > { %2120 = vmatpush3.msra.mxu1 %v465_v59  ;;  %2083 = vmatprep.subr.mxu0 %v1743_v60  ;;  %v456_v13 = vld [vmem:[%s3246_s1 + $0x18] sm:$0xff]  ;;  %v455_v15 = vld [vmem:[%s3246_s1 + $0x10] sm:$0xff]  ;;  %v454_v17 = vld [vmem:[%s3246_s1 + $0x8] sm:$0xff] }
  0x5a   : > { %2121 = vmatprep.subr.mxu1 %v464_v61  ;;  %2084 = vmatpush3.msra.mxu0 %v1743_v60  ;;  %v1732_v18 = vld [vmem:[%s3246_s1 + $0x80] sm:$0xff]  ;;  %v1729_v22 = vld [vmem:[%s2841_s22 + $0x31] ss:$2 sm:$0xff]  ;;  %v1725_v23 = vld [vmem:[%s2841_s22 + $0x30] ss:$2 sm:$0xff] }
  0x5b   : > { %2122 = vmatpush3.msra.mxu1 %v464_v61  ;;  %2085 = vmatprep.subr.mxu0 %v1742_v62  ;;  %v453_v19 = vld [vmem:[%s3246_s1] sm:$0xff]  ;;  %v1767_v24 = vld [vmem:[%s3246_s1 + $0x178] sm:$0xff]  ;;  %v1766_v26 = vld [vmem:[%s3246_s1 + $0x170] sm:$0xff] }
  0x5c   : > { %2123 = vmatprep.subr.mxu1 %v463_v63  ;;  %2086 = vmatpush3.msra.mxu0 %v1742_v62  ;;  %v1728_v20 = vld [vmem:[%s2841_s22 + $0x1] ss:$2 sm:$0xff]  ;;  %v446_v21 = vld [vmem:[%s2841_s22] ss:$2 sm:$0xff]  ;;  %v1786_v27 = vld [vmem:[%s3246_s1 + $0x1f0] sm:$0xff] }
  0x5d   : > { %2124 = vmatpush3.msra.mxu1 %v463_v63  ;;  %2087 = vmatprep.subr.mxu0 %v1741_v0  ;;  %v1787_v25 = vld [vmem:[%s3246_s1 + $0x1f8] sm:$0xff]  ;;  %v1765_v28 = vld [vmem:[%s3246_s1 + $0x168] sm:$0xff]  ;;  %v1764_v30 = vld [vmem:[%s3246_s1 + $0x160] sm:$0xff] }
  0x5e   : > { %2125 = vmatprep.subr.mxu1 %v462_v1  ;;  %2088 = vmatpush3.msra.mxu0 %v1741_v0  ;;  %v1785_v29 = vld [vmem:[%s3246_s1 + $0x1e8] sm:$0xff]  ;;  %v1784_v31 = vld [vmem:[%s3246_s1 + $0x1e0] sm:$0xff]  ;;  %v1763_v32 = vld [vmem:[%s3246_s1 + $0x158] sm:$0xff] }
  0x5f   : > { %2126 = vmatpush3.msra.mxu1 %v462_v1  ;;  %2089 = vmatprep.subr.mxu0 %v1740_v2  ;;  %v1783_v33 = vld [vmem:[%s3246_s1 + $0x1d8] sm:$0xff]  ;;  %v1762_v34 = vld [vmem:[%s3246_s1 + $0x150] sm:$0xff]  ;;  %v1761_v36 = vld [vmem:[%s3246_s1 + $0x148] sm:$0xff] }
  0x60   : > { %2127 = vmatprep.subr.mxu1 %v461_v3  ;;  %2090 = vmatpush3.msra.mxu0 %v1740_v2  ;;  %v1782_v35 = vld [vmem:[%s3246_s1 + $0x1d0] sm:$0xff]  ;;  %v1781_v37 = vld [vmem:[%s3246_s1 + $0x1c8] sm:$0xff]  ;;  %v1760_v38 = vld [vmem:[%s3246_s1 + $0x140] sm:$0xff] }
  0x61   : > { %2128 = vmatpush3.msra.mxu1 %v461_v3  ;;  %2091 = vmatprep.subr.mxu0 %v1739_v4  ;;  %v1780_v39 = vld [vmem:[%s3246_s1 + $0x1c0] sm:$0xff]  ;;  %v1759_v40 = vld [vmem:[%s3246_s1 + $0x138] sm:$0xff]  ;;  %v1758_v42 = vld [vmem:[%s3246_s1 + $0x130] sm:$0xff] }
  0x62   : > { %2129 = vmatprep.subr.mxu1 %v460_v5  ;;  %2092 = vmatpush3.msra.mxu0 %v1739_v4  ;;  %v1779_v41 = vld [vmem:[%s3246_s1 + $0x1b8] sm:$0xff]  ;;  %v1778_v43 = vld [vmem:[%s3246_s1 + $0x1b0] sm:$0xff]  ;;  %v1757_v44 = vld [vmem:[%s3246_s1 + $0x128] sm:$0xff] }
  0x63   : > { %2130 = vmatpush3.msra.mxu1 %v460_v5  ;;  %2093 = vmatprep.subr.mxu0 %v1738_v6  ;;  %v1777_v45 = vld [vmem:[%s3246_s1 + $0x1a8] sm:$0xff]  ;;  %v1756_v46 = vld [vmem:[%s3246_s1 + $0x120] sm:$0xff]  ;;  %v1755_v48 = vld [vmem:[%s3246_s1 + $0x118] sm:$0xff] }
  0x64   : > { %2131 = vmatprep.subr.mxu1 %v459_v7  ;;  %2094 = vmatpush3.msra.mxu0 %v1738_v6  ;;  %v1776_v47 = vld [vmem:[%s3246_s1 + $0x1a0] sm:$0xff]  ;;  %v1775_v49 = vld [vmem:[%s3246_s1 + $0x198] sm:$0xff]  ;;  %v1754_v52 = vld [vmem:[%s3246_s1 + $0x110] sm:$0xff] }
  0x65   : > { %2132 = vmatpush3.msra.mxu1 %v459_v7  ;;  %2095 = vmatprep.subr.mxu0 %v1737_v8  ;;  %v1730_v50 = vld [vmem:[%s2841_s22 + $0x61] ss:$2 sm:$0xff]  ;;  %v1726_v51 = vld [vmem:[%s2841_s22 + $0x60] ss:$2 sm:$0xff]  ;;  %v1774_v53 = vld [vmem:[%s3246_s1 + $0x190] sm:$0xff] }
  0x66   : > { %2133 = vmatprep.subr.mxu1 %v458_v9  ;;  %2096 = vmatpush3.msra.mxu0 %v1737_v8  ;;  %v1731_v54 = vld [vmem:[%s2841_s22 + $0x91] ss:$2 sm:$0xff]  ;;  %v1727_v55 = vld [vmem:[%s2841_s22 + $0x90] ss:$2 sm:$0xff]  ;;  %v1752_v58 = vld [vmem:[%s3246_s1 + $0x100] sm:$0xff] }
  0x67   : > { %2134 = vmatpush3.msra.mxu1 %v458_v9  ;;  %2097 = vmatprep.subr.mxu0 %v1736_v10  ;;  %v1753_v56 = vld [vmem:[%s3246_s1 + $0x108] sm:$0xff]  ;;  %v1772_v59 = vld [vmem:[%s3246_s1 + $0x180] sm:$0xff]  ;;  %v1807_v0 = vld [vmem:[%s3246_s1 + $0x278] sm:$0xff] }
  0x68   : > { %2135 = vmatprep.subr.mxu1 %v457_v11  ;;  %2098 = vmatpush3.msra.mxu0 %v1736_v10  ;;  %v1773_v57 = vld [vmem:[%s3246_s1 + $0x188] sm:$0xff]  ;;  %v1768_v61 = vld [vmem:[%s2841_s22 + $0x18] ss:$2 sm:$0xff] }
  0x69   : > { %2136 = vmatpush3.msra.mxu1 %v457_v11  ;;  %2099 = vmatprep.subr.mxu0 %v1735_v12  ;;  %v1748_v60 = vld [vmem:[%s2841_s22 + $0x2] ss:$2 sm:$0xff]  ;;  %v1749_v62 = vld [vmem:[%s2841_s22 + $0x32] ss:$2 sm:$0xff] }
  0x6a   : > { %2137 = vmatprep.subr.mxu1 %v456_v13  ;;  %2100 = vmatpush3.msra.mxu0 %v1735_v12  ;;  %v1769_v63 = vld [vmem:[%s2841_s22 + $0x48] ss:$2 sm:$0xff]  ;;  %v1827_v1 = vld [vmem:[%s3246_s1 + $0x2f8] sm:$0xff] }
  0x6b   : > { %2138 = vmatpush3.msra.mxu1 %v456_v13  ;;  %2101 = vmatprep.subr.mxu0 %v1734_v14  ;;  %v1806_v2 = vld [vmem:[%s3246_s1 + $0x270] sm:$0xff]  ;;  %v1805_v6 = vld [vmem:[%s3246_s1 + $0x268] sm:$0xff]  ;;  %v1804_v9 = vld [vmem:[%s3246_s1 + $0x260] sm:$0xff] }
  0x6c   : > { %2139 = vmatprep.subr.mxu1 %v455_v15  ;;  %2102 = vmatpush3.msra.mxu0 %v1734_v14  ;;  %v1826_v3 = vld [vmem:[%s3246_s1 + $0x2f0] sm:$0xff]  ;;  %v1825_v7 = vld [vmem:[%s3246_s1 + $0x2e8] sm:$0xff]  ;;  %v1824_v11 = vld [vmem:[%s3246_s1 + $0x2e0] sm:$0xff] }
  0x6d   : > { %2140 = vmatpush3.msra.mxu1 %v455_v15  ;;  %2103 = vmatprep.subr.mxu0 %v1733_v16  ;;  %v1750_v4 = vld [vmem:[%s2841_s22 + $0x62] ss:$2 sm:$0xff]  ;;  %v1751_v5 = vld [vmem:[%s2841_s22 + $0x92] ss:$2 sm:$0xff] }
  0x6e   : > { %2141 = vmatprep.subr.mxu1 %v454_v17  ;;  %2104 = vmatpush3.msra.mxu0 %v1733_v16  ;;  %v1770_v8 = vld [vmem:[%s2841_s22 + $0x78] ss:$2 sm:$0xff]  ;;  %v1771_v10 = vld [vmem:[%s2841_s22 + $0xa8] ss:$2 sm:$0xff] }
  0x6f   : > { %2142 = vmatpush3.msra.mxu1 %v454_v17  ;;  %2105 = vmatprep.subr.mxu0 %v1732_v18  ;;  %v1803_v12 = vld [vmem:[%s3246_s1 + $0x258] sm:$0xff]  ;;  %v1802_v14 = vld [vmem:[%s3246_s1 + $0x250] sm:$0xff]  ;;  %v1801_v16 = vld [vmem:[%s3246_s1 + $0x248] sm:$0xff] }
  0x70   : > { %2143 = vmatprep.subr.mxu1 %v453_v19  ;;  %2106 = vmatpush3.msra.mxu0 %v1732_v18  ;;  %v1823_v13 = vld [vmem:[%s3246_s1 + $0x2d8] sm:$0xff]  ;;  %v1822_v15 = vld [vmem:[%s3246_s1 + $0x2d0] sm:$0xff]  ;;  %v1821_v17 = vld [vmem:[%s3246_s1 + $0x2c8] sm:$0xff] }
  0x71   : > { %2107 = vmatprep.mubr.f32.mxu0 %v1728_v20  ;;  %2144 = vmatpush3.msra.mxu1 %v453_v19  ;;  %v1800_v18 = vld [vmem:[%s3246_s1 + $0x240] sm:$0xff]  ;;  %v1799_v20 = vld [vmem:[%s3246_s1 + $0x238] sm:$0xff] }
  0x72   : > { %2145 = vmatprep.mubr.f32.mxu1 %v446_v21  ;;  %2108 = vmatmul.mubr.f32.vlgmr.msra.gmra.mxu0 %v1729_v22  ;;  %v1820_v19 = vld [vmem:[%s3246_s1 + $0x2c0] sm:$0xff]  ;;  %v1819_v21 = vld [vmem:[%s3246_s1 + $0x2b8] sm:$0xff]  ;;  %v1798_v22 = vld [vmem:[%s3246_s1 + $0x230] sm:$0xff] }
  0x73   : > { %2146 = vmatmul.mubr.f32.vlgmr.msra.gmra.mxu1 %v1725_v23  ;;  %2151 = vmatprep.subr.mxu0 %v1767_v24  ;;  %v1818_v23 = vld [vmem:[%s3246_s1 + $0x2b0] sm:$0xff] }
  0x74   : > { %2189 = vmatprep.subr.mxu1 %v1787_v25  ;;  %2152 = vmatpush3.msra.mxu0 %v1767_v24  ;;  %v1797_v24 = vld [vmem:[%s3246_s1 + $0x228] sm:$0xff] }
  0x75   : > { %2190 = vmatpush3.msra.mxu1 %v1787_v25  ;;  %2153 = vmatprep.subr.mxu0 %v1766_v26  ;;  %v1817_v25 = vld [vmem:[%s3246_s1 + $0x2a8] sm:$0xff] }
  0x76   : > { %2191 = vmatprep.subr.mxu1 %v1786_v27  ;;  %2154 = vmatpush3.msra.mxu0 %v1766_v26  ;;  %v1796_v26 = vld [vmem:[%s3246_s1 + $0x220] sm:$0xff] }
  0x77   : > { %2192 = vmatpush3.msra.mxu1 %v1786_v27  ;;  %2155 = vmatprep.subr.mxu0 %v1765_v28  ;;  %v1816_v27 = vld [vmem:[%s3246_s1 + $0x2a0] sm:$0xff] }
  0x78   : > { %2193 = vmatprep.subr.mxu1 %v1785_v29  ;;  %2156 = vmatpush3.msra.mxu0 %v1765_v28  ;;  %v1795_v28 = vld [vmem:[%s3246_s1 + $0x218] sm:$0xff] }
  0x79   : > { %2194 = vmatpush3.msra.mxu1 %v1785_v29  ;;  %2157 = vmatprep.subr.mxu0 %v1764_v30  ;;  %v1815_v29 = vld [vmem:[%s3246_s1 + $0x298] sm:$0xff] }
  0x7a   : > { %2195 = vmatprep.subr.mxu1 %v1784_v31  ;;  %2158 = vmatpush3.msra.mxu0 %v1764_v30  ;;  %v1794_v30 = vld [vmem:[%s3246_s1 + $0x210] sm:$0xff] }
  0x7b   : > { %2196 = vmatpush3.msra.mxu1 %v1784_v31  ;;  %2159 = vmatprep.subr.mxu0 %v1763_v32  ;;  %v1814_v31 = vld [vmem:[%s3246_s1 + $0x290] sm:$0xff] }
  0x7c   : > { %2197 = vmatprep.subr.mxu1 %v1783_v33  ;;  %2160 = vmatpush3.msra.mxu0 %v1763_v32  ;;  %v1793_v32 = vld [vmem:[%s3246_s1 + $0x208] sm:$0xff] }
  0x7d   : > { %2198 = vmatpush3.msra.mxu1 %v1783_v33  ;;  %2161 = vmatprep.subr.mxu0 %v1762_v34  ;;  %v1813_v33 = vld [vmem:[%s3246_s1 + $0x288] sm:$0xff] }
  0x7e   : > { %2199 = vmatprep.subr.mxu1 %v1782_v35  ;;  %2162 = vmatpush3.msra.mxu0 %v1762_v34  ;;  %v1792_v34 = vld [vmem:[%s3246_s1 + $0x200] sm:$0xff] }
  0x7f   : > { %2200 = vmatpush3.msra.mxu1 %v1782_v35  ;;  %2163 = vmatprep.subr.mxu0 %v1761_v36  ;;  %v1812_v35 = vld [vmem:[%s3246_s1 + $0x280] sm:$0xff] }
  0x80   : > { %2201 = vmatprep.subr.mxu1 %v1781_v37  ;;  %2164 = vmatpush3.msra.mxu0 %v1761_v36  ;;  %v1788_v36 = vld [vmem:[%s2841_s22 + $0x19] ss:$2 sm:$0xff] }
  0x81   : > { %2202 = vmatpush3.msra.mxu1 %v1781_v37  ;;  %2165 = vmatprep.subr.mxu0 %v1760_v38  ;;  %v1808_v37 = vld [vmem:[%s2841_s22 + $0x1a] ss:$2 sm:$0xff] }
  0x82   : > { %2203 = vmatprep.subr.mxu1 %v1780_v39  ;;  %2166 = vmatpush3.msra.mxu0 %v1760_v38  ;;  %v1789_v38 = vld [vmem:[%s2841_s22 + $0x49] ss:$2 sm:$0xff] }
  0x83   : > { %2204 = vmatpush3.msra.mxu1 %v1780_v39  ;;  %2167 = vmatprep.subr.mxu0 %v1759_v40  ;;  %v1809_v39 = vld [vmem:[%s2841_s22 + $0x4a] ss:$2 sm:$0xff] }
  0x84   : > { %2205 = vmatprep.subr.mxu1 %v1779_v41  ;;  %2168 = vmatpush3.msra.mxu0 %v1759_v40  ;;  %v1847_v40 = vld [vmem:[%s3246_s1 + $0x378] sm:$0xff] }
  0x85   : > { %2206 = vmatpush3.msra.mxu1 %v1779_v41  ;;  %2169 = vmatprep.subr.mxu0 %v1758_v42  ;;  %v1867_v41 = vld [vmem:[%s3246_s1 + $0x3f8] sm:$0xff] }
  0x86   : > { %2207 = vmatprep.subr.mxu1 %v1778_v43  ;;  %2170 = vmatpush3.msra.mxu0 %v1758_v42  ;;  %v1846_v42 = vld [vmem:[%s3246_s1 + $0x370] sm:$0xff] }
  0x87   : > { %2208 = vmatpush3.msra.mxu1 %v1778_v43  ;;  %2171 = vmatprep.subr.mxu0 %v1757_v44  ;;  %v1866_v43 = vld [vmem:[%s3246_s1 + $0x3f0] sm:$0xff] }
  0x88   : > { %2209 = vmatprep.subr.mxu1 %v1777_v45  ;;  %2172 = vmatpush3.msra.mxu0 %v1757_v44  ;;  %v1790_v44 = vld [vmem:[%s2841_s22 + $0x79] ss:$2 sm:$0xff] }
  0x89   : > { %2210 = vmatpush3.msra.mxu1 %v1777_v45  ;;  %2173 = vmatprep.subr.mxu0 %v1756_v46  ;;  %v1791_v45 = vld [vmem:[%s2841_s22 + $0xa9] ss:$2 sm:$0xff] }
  0x8a   : > { %2211 = vmatprep.subr.mxu1 %v1776_v47  ;;  %2174 = vmatpush3.msra.mxu0 %v1756_v46  ;;  %v1845_v46 = vld [vmem:[%s3246_s1 + $0x368] sm:$0xff] }
  0x8b   : > { %2212 = vmatpush3.msra.mxu1 %v1776_v47  ;;  %2175 = vmatprep.subr.mxu0 %v1755_v48  ;;  %v1865_v47 = vld [vmem:[%s3246_s1 + $0x3e8] sm:$0xff] }
  0x8c   : > { %2213 = vmatprep.subr.mxu1 %v1775_v49  ;;  %2176 = vmatpush3.msra.mxu0 %v1755_v48  ;;  %v1810_v48 = vld [vmem:[%s2841_s22 + $0x7a] ss:$2 sm:$0xff] }
  0x8d   : > { %2214 = vmatpush3.msra.mxu1 %v1775_v49  ;;  %2110 = vmatprep.mubr.f32.mxu0 %v1730_v50  ;;  %v1844_v49 = vld [vmem:[%s3246_s1 + $0x360] sm:$0xff] }
  0x8e   : > { %2148 = vmatprep.mubr.f32.mxu1 %v1726_v51  ;;  %2177 = vmatprep.subr.mxu0 %v1754_v52  ;;  %v1811_v50 = vld [vmem:[%s2841_s22 + $0xaa] ss:$2 sm:$0xff] }
  0x8f   : > { %2215 = vmatprep.subr.mxu1 %v1774_v53  ;;  %2111 = vmatmul.mubr.f32.gmra.mxu0 %v1731_v54  ;;  %v1864_v51 = vld [vmem:[%s3246_s1 + $0x3e0] sm:$0xff]  ;;  %v1842_v54 = vld [vmem:[%s3246_s1 + $0x350] sm:$0xff] }
  0x90   : > { %2149 = vmatmul.mubr.f32.gmra.mxu1 %v1727_v55  ;;  %2178 = vmatpush3.msra.mxu0 %v1754_v52  ;;  %v1843_v52 = vld [vmem:[%s3246_s1 + $0x358] sm:$0xff]  ;;  %v1862_v55 = vld [vmem:[%s3246_s1 + $0x3d0] sm:$0xff] }
  0x91   : > { %2216 = vmatpush3.msra.mxu1 %v1774_v53  ;;  %2179 = vmatprep.subr.mxu0 %v1753_v56  ;;  %v1863_v53 = vld [vmem:[%s3246_s1 + $0x3d8] sm:$0xff] }
  0x92   : > { %2217 = vmatprep.subr.mxu1 %v1773_v57  ;;  %2180 = vmatpush3.msra.mxu0 %v1753_v56  ;;  %v1841_v56 = vld [vmem:[%s3246_s1 + $0x348] sm:$0xff] }
  0x93   : > { %2218 = vmatpush3.msra.mxu1 %v1773_v57  ;;  %2181 = vmatprep.subr.mxu0 %v1752_v58  ;;  %v1861_v57 = vld [vmem:[%s3246_s1 + $0x3c8] sm:$0xff] }
  0x94   : > { %2219 = vmatprep.subr.mxu1 %v1772_v59  ;;  %2182 = vmatpush3.msra.mxu0 %v1752_v58  ;;  %v1840_v58 = vld [vmem:[%s3246_s1 + $0x340] sm:$0xff] }
  0x95   : > { %2183 = vmatprep.mubr.f32.mxu0 %v1748_v60  ;;  %2220 = vmatpush3.msra.mxu1 %v1772_v59  ;;  %v1860_v59 = vld [vmem:[%s3246_s1 + $0x3c0] sm:$0xff]  ;;  %v1839_v60 = vld [vmem:[%s3246_s1 + $0x338] sm:$0xff] }
  0x96   : > { %2221 = vmatprep.mubr.f32.mxu1 %v1768_v61  ;;  %2184 = vmatmul.mubr.f32.vlgmr.msra.gmra.mxu0 %v1749_v62  ;;  %v1859_v61 = vld [vmem:[%s3246_s1 + $0x3b8] sm:$0xff]  ;;  %v1838_v62 = vld [vmem:[%s3246_s1 + $0x330] sm:$0xff] }
  0x97   : > { %2222 = vmatmul.mubr.f32.vlgmr.msra.gmra.mxu1 %v1769_v63  ;;  %2227 = vmatprep.subr.mxu0 %v1807_v0  ;;  %v1858_v63 = vld [vmem:[%s3246_s1 + $0x3b0] sm:$0xff] }
  0x98   : > { %2265 = vmatprep.subr.mxu1 %v1827_v1  ;;  %2228 = vmatpush3.msra.mxu0 %v1807_v0  ;;  %v1837_v0 = vld [vmem:[%s3246_s1 + $0x328] sm:$0xff] }
  0x99   : > { %2266 = vmatpush3.msra.mxu1 %v1827_v1  ;;  %2229 = vmatprep.subr.mxu0 %v1806_v2  ;;  %v1857_v1 = vld [vmem:[%s3246_s1 + $0x3a8] sm:$0xff] }
  0x9a   : > { %2267 = vmatprep.subr.mxu1 %v1826_v3  ;;  %2186 = vmatprep.mubr.f32.mxu0 %v1750_v4  ;;  %v1835_v4 = vld [vmem:[%s3246_s1 + $0x318] sm:$0xff] }
  0x9b   : > { %2230 = vmatpush3.msra.mxu0 %v1806_v2  ;;  %2268 = vmatpush3.msra.mxu1 %v1826_v3  ;;  %v1836_v2 = vld [vmem:[%s3246_s1 + $0x320] sm:$0xff] }
  0x9c   : > { %2187 = vmatmul.mubr.f32.gmra.mxu0 %v1751_v5  ;;  %2231 = vmatprep.subr.mxu0 %v1805_v6  ;;  %v1856_v3 = vld [vmem:[%s3246_s1 + $0x3a0] sm:$0xff]  ;;  %v1855_v5 = vld [vmem:[%s3246_s1 + $0x398] sm:$0xff] }
  0x9d   : > { %2269 = vmatprep.subr.mxu1 %v1825_v7  ;;  %2224 = vmatprep.mubr.f32.mxu1 %v1770_v8  ;;  %v1833_v8 = vld [vmem:[%s3246_s1 + $0x308] sm:$0xff] }
  0x9e   : > { %2232 = vmatpush3.msra.mxu0 %v1805_v6  ;;  %2270 = vmatpush3.msra.mxu1 %v1825_v7  ;;  %v1834_v6 = vld [vmem:[%s3246_s1 + $0x310] sm:$0xff] }
  0x9f   : > { %2233 = vmatprep.subr.mxu0 %v1804_v9  ;;  %2225 = vmatmul.mubr.f32.gmra.mxu1 %v1771_v10  ;;  %v1854_v7 = vld [vmem:[%s3246_s1 + $0x390] sm:$0xff]  ;;  %v1832_v10 = vld [vmem:[%s3246_s1 + $0x300] sm:$0xff] }
  0xa0   : > { %2271 = vmatprep.subr.mxu1 %v1824_v11  ;;  %2234 = vmatpush3.msra.mxu0 %v1804_v9  ;;  %v1853_v9 = vld [vmem:[%s3246_s1 + $0x388] sm:$0xff] }
  0xa1   : > { %2272 = vmatpush3.msra.mxu1 %v1824_v11  ;;  %2235 = vmatprep.subr.mxu0 %v1803_v12  ;;  %v1852_v11 = vld [vmem:[%s3246_s1 + $0x380] sm:$0xff] }
  0xa2   : > { %2273 = vmatprep.subr.mxu1 %v1823_v13  ;;  %2236 = vmatpush3.msra.mxu0 %v1803_v12  ;;  %v1828_v12 = vld [vmem:[%s2841_s22 + $0x30] ss:$2 sm:$0xff] }
  0xa3   : > { %2274 = vmatpush3.msra.mxu1 %v1823_v13  ;;  %2237 = vmatprep.subr.mxu0 %v1802_v14  ;;  %v1848_v13 = vld [vmem:[%s2841_s22 + $0x31] ss:$2 sm:$0xff] }
  0xa4   : > { %2275 = vmatprep.subr.mxu1 %v1822_v15  ;;  %2238 = vmatpush3.msra.mxu0 %v1802_v14  ;;  %v1829_v14 = vld [vmem:[%s2841_s22 + $0x60] ss:$2 sm:$0xff] }
  0xa5   : > { %2276 = vmatpush3.msra.mxu1 %v1822_v15  ;;  %2239 = vmatprep.subr.mxu0 %v1801_v16  ;;  %v1849_v15 = vld [vmem:[%s2841_s22 + $0x61] ss:$2 sm:$0xff] }
  0xa6   : > { %2277 = vmatprep.subr.mxu1 %v1821_v17  ;;  %2240 = vmatpush3.msra.mxu0 %v1801_v16  ;;  %v1887_v16 = vld [vmem:[%s3246_s1 + $0x478] sm:$0xff] }
  0xa7   : > { %2278 = vmatpush3.msra.mxu1 %v1821_v17  ;;  %2241 = vmatprep.subr.mxu0 %v1800_v18  ;;  %v1886_v17 = vld [vmem:[%s3246_s1 + $0x470] sm:$0xff] }
  0xa8   : > { %2279 = vmatprep.subr.mxu1 %v1820_v19  ;;  %2242 = vmatpush3.msra.mxu0 %v1800_v18  ;;  %v1830_v18 = vld [vmem:[%s2841_s22 + $0x90] ss:$2 sm:$0xff] }
  0xa9   : > { %2280 = vmatpush3.msra.mxu1 %v1820_v19  ;;  %2243 = vmatprep.subr.mxu0 %v1799_v20  ;;  %v1831_v19 = vld [vmem:[%s2841_s22 + $0xc0] ss:$2 sm:$0xff] }
  0xaa   : > { %2281 = vmatprep.subr.mxu1 %v1819_v21  ;;  %2244 = vmatpush3.msra.mxu0 %v1799_v20  ;;  %v1885_v20 = vld [vmem:[%s3246_s1 + $0x468] sm:$0xff] }
  0xab   : > { %2282 = vmatpush3.msra.mxu1 %v1819_v21  ;;  %2245 = vmatprep.subr.mxu0 %v1798_v22  ;;  %v1850_v21 = vld [vmem:[%s2841_s22 + $0x91] ss:$2 sm:$0xff] }
  0xac   : > { %2283 = vmatprep.subr.mxu1 %v1818_v23  ;;  %2246 = vmatpush3.msra.mxu0 %v1798_v22  ;;  %v1884_v22 = vld [vmem:[%s3246_s1 + $0x460] sm:$0xff] }
  0xad   : > { %2284 = vmatpush3.msra.mxu1 %v1818_v23  ;;  %2247 = vmatprep.subr.mxu0 %v1797_v24  ;;  %v1851_v23 = vld [vmem:[%s2841_s22 + $0xc1] ss:$2 sm:$0xff] }
  0xae   : > { %2285 = vmatprep.subr.mxu1 %v1817_v25  ;;  %2248 = vmatpush3.msra.mxu0 %v1797_v24  ;;  %v1883_v24 = vld [vmem:[%s3246_s1 + $0x458] sm:$0xff] }
  0xaf   : > { %2286 = vmatpush3.msra.mxu1 %v1817_v25  ;;  %2249 = vmatprep.subr.mxu0 %v1796_v26  ;;  %v1882_v25 = vld [vmem:[%s3246_s1 + $0x450] sm:$0xff] }
  0xb0   : > { %2287 = vmatprep.subr.mxu1 %v1816_v27  ;;  %2250 = vmatpush3.msra.mxu0 %v1796_v26  ;;  %v1881_v26 = vld [vmem:[%s3246_s1 + $0x448] sm:$0xff] }
  0xb1   : > { %2288 = vmatpush3.msra.mxu1 %v1816_v27  ;;  %2251 = vmatprep.subr.mxu0 %v1795_v28  ;;  %v1880_v27 = vld [vmem:[%s3246_s1 + $0x440] sm:$0xff] }
  0xb2   : > { %2289 = vmatprep.subr.mxu1 %v1815_v29  ;;  %2252 = vmatpush3.msra.mxu0 %v1795_v28  ;;  %v1879_v28 = vld [vmem:[%s3246_s1 + $0x438] sm:$0xff] }
  0xb3   : > { %2290 = vmatpush3.msra.mxu1 %v1815_v29  ;;  %2253 = vmatprep.subr.mxu0 %v1794_v30  ;;  %v1878_v29 = vld [vmem:[%s3246_s1 + $0x430] sm:$0xff] }
  0xb4   : > { %2291 = vmatprep.subr.mxu1 %v1814_v31  ;;  %2254 = vmatpush3.msra.mxu0 %v1794_v30  ;;  %v1877_v30 = vld [vmem:[%s3246_s1 + $0x428] sm:$0xff] }
  0xb5   : > { %2292 = vmatpush3.msra.mxu1 %v1814_v31  ;;  %2255 = vmatprep.subr.mxu0 %v1793_v32  ;;  %v1876_v31 = vld [vmem:[%s3246_s1 + $0x420] sm:$0xff] }
  0xb6   : > { %2293 = vmatprep.subr.mxu1 %v1813_v33  ;;  %2256 = vmatpush3.msra.mxu0 %v1793_v32  ;;  %v1875_v32 = vld [vmem:[%s3246_s1 + $0x418] sm:$0xff] }
  0xb7   : > { %2294 = vmatpush3.msra.mxu1 %v1813_v33  ;;  %2257 = vmatprep.subr.mxu0 %v1792_v34  ;;  %v1874_v33 = vld [vmem:[%s3246_s1 + $0x410] sm:$0xff] }
  0xb8   : > { %2295 = vmatprep.subr.mxu1 %v1812_v35  ;;  %2258 = vmatpush3.msra.mxu0 %v1792_v34  ;;  %v1873_v34 = vld [vmem:[%s3246_s1 + $0x408] sm:$0xff] }
  0xb9   : > { %2259 = vmatprep.mubr.f32.mxu0 %v1788_v36  ;;  %2296 = vmatpush3.msra.mxu1 %v1812_v35  ;;  %v1872_v35 = vld [vmem:[%s3246_s1 + $0x400] sm:$0xff] }
  0xba   : > { %2297 = vmatprep.mubr.f32.mxu1 %v1808_v37  ;;  %2260 = vmatmul.mubr.f32.vlgmr.msra.gmra.mxu0 %v1789_v38  ;;  %v1868_v36 = vld [vmem:[%s2841_s22 + $0x32] ss:$2 sm:$0xff]  ;;  %v1869_v38 = vld [vmem:[%s2841_s22 + $0x62] ss:$2 sm:$0xff] }
  0xbb   : > { %2298 = vmatmul.mubr.f32.vlgmr.msra.gmra.mxu1 %v1809_v39  ;;  %2303 = vmatprep.subr.mxu0 %v1847_v40  ;;  %v1870_v37 = vld [vmem:[%s2841_s22 + $0x92] ss:$2 sm:$0xff]  ;;  %v1871_v39 = vld [vmem:[%s2841_s22 + $0xc2] ss:$2 sm:$0xff] }
  0xbc   : > { %2341 = vmatprep.subr.mxu1 %v1867_v41  ;;  %2304 = vmatpush3.msra.mxu0 %v1847_v40  ;;  %v2541_v40 = vmov 0.0  }
  0xbd   : > { %2342 = vmatpush3.msra.mxu1 %v1867_v41  ;;  %2305 = vmatprep.subr.mxu0 %v1846_v42  ;;  %1481 = vst [vmem:[%s2605_s4] sm:$0x1] %v2541_v40  ;;  %1482 = vst [vmem:[%s2605_s4 + $0x10] sm:$0x1] %v2541_v40 }
  0xbe   : > { %2343 = vmatprep.subr.mxu1 %v1866_v43  ;;  %2262 = vmatprep.mubr.f32.mxu0 %v1790_v44  ;;  %1483 = vst [vmem:[%s2605_s4 + $0x20] sm:$0x1] %v2541_v40  ;;  %1484 = vst [vmem:[%s2605_s4 + $0x30] sm:$0x1] %v2541_v40 }
  0xbf   : > { %2306 = vmatpush3.msra.mxu0 %v1846_v42  ;;  %2344 = vmatpush3.msra.mxu1 %v1866_v43  ;;  %1485 = vst [vmem:[%s2605_s4 + $0x9] sm:$0x1] %v2541_v40  ;;  %1486 = vst [vmem:[%s2605_s4 + $0x19] sm:$0x1] %v2541_v40 }
  0xc0   : > { %2263 = vmatmul.mubr.f32.gmra.mxu0 %v1791_v45  ;;  %2307 = vmatprep.subr.mxu0 %v1845_v46  ;;  %1487 = vst [vmem:[%s2605_s4 + $0x29] sm:$0x1] %v2541_v40  ;;  %1488 = vst [vmem:[%s2605_s4 + $0x39] sm:$0x1] %v2541_v40 }
  0xc1   : > { %2345 = vmatprep.subr.mxu1 %v1865_v47  ;;  %2300 = vmatprep.mubr.f32.mxu1 %v1810_v48 }
  0xc2   : > { %2308 = vmatpush3.msra.mxu0 %v1845_v46  ;;  %2346 = vmatpush3.msra.mxu1 %v1865_v47 }
  0xc3   : > { %2309 = vmatprep.subr.mxu0 %v1844_v49  ;;  %2301 = vmatmul.mubr.f32.gmra.mxu1 %v1811_v50 }
  0xc4   : > { %2347 = vmatprep.subr.mxu1 %v1864_v51  ;;  %2310 = vmatpush3.msra.mxu0 %v1844_v49 }
  0xc5   : > { %2348 = vmatpush3.msra.mxu1 %v1864_v51  ;;  %2311 = vmatprep.subr.mxu0 %v1843_v52 }
  0xc6   : > { %2349 = vmatprep.subr.mxu1 %v1863_v53  ;;  %2312 = vmatpush3.msra.mxu0 %v1843_v52 }
  0xc7   : > { %2350 = vmatpush3.msra.mxu1 %v1863_v53  ;;  %2313 = vmatprep.subr.mxu0 %v1842_v54 }
  0xc8   : > { %2351 = vmatprep.subr.mxu1 %v1862_v55  ;;  %2314 = vmatpush3.msra.mxu0 %v1842_v54 }
  0xc9   : > { %2352 = vmatpush3.msra.mxu1 %v1862_v55  ;;  %2315 = vmatprep.subr.mxu0 %v1841_v56 }
  0xca   : > { %2353 = vmatprep.subr.mxu1 %v1861_v57  ;;  %2316 = vmatpush3.msra.mxu0 %v1841_v56 }
  0xcb   : > { %2354 = vmatpush3.msra.mxu1 %v1861_v57  ;;  %2317 = vmatprep.subr.mxu0 %v1840_v58 }
  0xcc   : > { %2355 = vmatprep.subr.mxu1 %v1860_v59  ;;  %2318 = vmatpush3.msra.mxu0 %v1840_v58 }
  0xcd   : > { %2356 = vmatpush3.msra.mxu1 %v1860_v59  ;;  %2319 = vmatprep.subr.mxu0 %v1839_v60 }
  0xce   : > { %2357 = vmatprep.subr.mxu1 %v1859_v61  ;;  %2320 = vmatpush3.msra.mxu0 %v1839_v60 }
  0xcf   : > { %2358 = vmatpush3.msra.mxu1 %v1859_v61  ;;  %2321 = vmatprep.subr.mxu0 %v1838_v62 }
  0xd0   : > { %2359 = vmatprep.subr.mxu1 %v1858_v63  ;;  %2322 = vmatpush3.msra.mxu0 %v1838_v62 }
  0xd1   : > { %2360 = vmatpush3.msra.mxu1 %v1858_v63  ;;  %2323 = vmatprep.subr.mxu0 %v1837_v0 }
  0xd2   : > { %2361 = vmatprep.subr.mxu1 %v1857_v1  ;;  %2324 = vmatpush3.msra.mxu0 %v1837_v0 }
  0xd3   : > { %2362 = vmatpush3.msra.mxu1 %v1857_v1  ;;  %2325 = vmatprep.subr.mxu0 %v1836_v2 }
  0xd4   : > { %2363 = vmatprep.subr.mxu1 %v1856_v3  ;;  %2326 = vmatpush3.msra.mxu0 %v1836_v2 }
  0xd5   : > { %2364 = vmatpush3.msra.mxu1 %v1856_v3  ;;  %2327 = vmatprep.subr.mxu0 %v1835_v4 }
  0xd6   : > { %2365 = vmatprep.subr.mxu1 %v1855_v5  ;;  %2328 = vmatpush3.msra.mxu0 %v1835_v4 }
  0xd7   : > { %2366 = vmatpush3.msra.mxu1 %v1855_v5  ;;  %2329 = vmatprep.subr.mxu0 %v1834_v6 }
  0xd8   : > { %2367 = vmatprep.subr.mxu1 %v1854_v7  ;;  %2330 = vmatpush3.msra.mxu0 %v1834_v6 }
  0xd9   : > { %2368 = vmatpush3.msra.mxu1 %v1854_v7  ;;  %2331 = vmatprep.subr.mxu0 %v1833_v8 }
  0xda   : > { %2369 = vmatprep.subr.mxu1 %v1853_v9  ;;  %2332 = vmatpush3.msra.mxu0 %v1833_v8 }
  0xdb   : > { %2370 = vmatpush3.msra.mxu1 %v1853_v9  ;;  %2333 = vmatprep.subr.mxu0 %v1832_v10 }
  0xdc   : > { %2371 = vmatprep.subr.mxu1 %v1852_v11  ;;  %2334 = vmatpush3.msra.mxu0 %v1832_v10 }
  0xdd   : > { %2335 = vmatprep.mubr.f32.mxu0 %v1828_v12  ;;  %2372 = vmatpush3.msra.mxu1 %v1852_v11 }
  0xde   : > { %2373 = vmatprep.mubr.f32.mxu1 %v1848_v13  ;;  %2336 = vmatmul.mubr.f32.vlgmr.msra.gmra.mxu0 %v1829_v14 }
  0xdf   : > { %2374 = vmatmul.mubr.f32.vlgmr.msra.gmra.mxu1 %v1849_v15  ;;  %2379 = vmatprep.subr.mxu0 %v1887_v16 }
  0xe0   : > { %2417 = vmatprep.subr.mxu1 %v1887_v16  ;;  %2380 = vmatpush3.msra.mxu0 %v1887_v16 }
  0xe1   : > { %2433 = vmatpush3.msra.mxu1 %v1887_v16  ;;  %2381 = vmatprep.subr.mxu0 %v1886_v17 }
  0xe2   : > { %2418 = vmatprep.subr.mxu1 %v1886_v17  ;;  %2338 = vmatprep.mubr.f32.mxu0 %v1830_v18 }
  0xe3   : > { %2382 = vmatpush3.msra.mxu0 %v1886_v17  ;;  %2434 = vmatpush3.msra.mxu1 %v1886_v17 }
  0xe4   : > { %2339 = vmatmul.mubr.f32.gmra.mxu0 %v1831_v19  ;;  %2383 = vmatprep.subr.mxu0 %v1885_v20 }
  0xe5   : > { %2419 = vmatprep.subr.mxu1 %v1885_v20  ;;  %2376 = vmatprep.mubr.f32.mxu1 %v1850_v21 }
  0xe6   : > { %2384 = vmatpush3.msra.mxu0 %v1885_v20  ;;  %2435 = vmatpush3.msra.mxu1 %v1885_v20 }
  0xe7   : > { %2385 = vmatprep.subr.mxu0 %v1884_v22  ;;  %2377 = vmatmul.mubr.f32.gmra.mxu1 %v1851_v23 }
  0xe8   : > { %2420 = vmatprep.subr.mxu1 %v1884_v22  ;;  %2386 = vmatpush3.msra.mxu0 %v1884_v22 }
  0xe9   : > { %2436 = vmatpush3.msra.mxu1 %v1884_v22  ;;  %2387 = vmatprep.subr.mxu0 %v1883_v24 }
  0xea   : > { %2421 = vmatprep.subr.mxu1 %v1883_v24  ;;  %2388 = vmatpush3.msra.mxu0 %v1883_v24 }
  0xeb   : > { %2437 = vmatpush3.msra.mxu1 %v1883_v24  ;;  %2389 = vmatprep.subr.mxu0 %v1882_v25 }
  0xec   : > { %2422 = vmatprep.subr.mxu1 %v1882_v25  ;;  %2390 = vmatpush3.msra.mxu0 %v1882_v25 }
  0xed   : > { %2438 = vmatpush3.msra.mxu1 %v1882_v25  ;;  %2391 = vmatprep.subr.mxu0 %v1881_v26 }
  0xee   : > { %2423 = vmatprep.subr.mxu1 %v1881_v26  ;;  %2392 = vmatpush3.msra.mxu0 %v1881_v26 }
  0xef   : > { %2439 = vmatpush3.msra.mxu1 %v1881_v26  ;;  %2393 = vmatprep.subr.mxu0 %v1880_v27 }
  0xf0   : > { %2424 = vmatprep.subr.mxu1 %v1880_v27  ;;  %2394 = vmatpush3.msra.mxu0 %v1880_v27 }
  0xf1   : > { %2440 = vmatpush3.msra.mxu1 %v1880_v27  ;;  %2395 = vmatprep.subr.mxu0 %v1879_v28 }
  0xf2   : > { %2425 = vmatprep.subr.mxu1 %v1879_v28  ;;  %2396 = vmatpush3.msra.mxu0 %v1879_v28 }
  0xf3   : > { %2441 = vmatpush3.msra.mxu1 %v1879_v28  ;;  %2397 = vmatprep.subr.mxu0 %v1878_v29 }
  0xf4   : > { %2426 = vmatprep.subr.mxu1 %v1878_v29  ;;  %2398 = vmatpush3.msra.mxu0 %v1878_v29 }
  0xf5   : > { %2442 = vmatpush3.msra.mxu1 %v1878_v29  ;;  %2399 = vmatprep.subr.mxu0 %v1877_v30 }
  0xf6   : > { %2427 = vmatprep.subr.mxu1 %v1877_v30  ;;  %2400 = vmatpush3.msra.mxu0 %v1877_v30 }
  0xf7   : > { %2443 = vmatpush3.msra.mxu1 %v1877_v30  ;;  %2401 = vmatprep.subr.mxu0 %v1876_v31 }
  0xf8   : > { %2428 = vmatprep.subr.mxu1 %v1876_v31  ;;  %2402 = vmatpush3.msra.mxu0 %v1876_v31 }
  0xf9   : > { %2444 = vmatpush3.msra.mxu1 %v1876_v31  ;;  %2403 = vmatprep.subr.mxu0 %v1875_v32 }
  0xfa   : > { %2429 = vmatprep.subr.mxu1 %v1875_v32  ;;  %2404 = vmatpush3.msra.mxu0 %v1875_v32 }
  0xfb   : > { %2445 = vmatpush3.msra.mxu1 %v1875_v32  ;;  %2405 = vmatprep.subr.mxu0 %v1874_v33 }
  0xfc   : > { %2430 = vmatprep.subr.mxu1 %v1874_v33  ;;  %2406 = vmatpush3.msra.mxu0 %v1874_v33 }
  0xfd   : > { %2446 = vmatpush3.msra.mxu1 %v1874_v33  ;;  %2407 = vmatprep.subr.mxu0 %v1873_v34 }
  0xfe   : > { %2431 = vmatprep.subr.mxu1 %v1873_v34  ;;  %2408 = vmatpush3.msra.mxu0 %v1873_v34 }
  0xff   : > { %2447 = vmatpush3.msra.mxu1 %v1873_v34  ;;  %2409 = vmatprep.subr.mxu0 %v1872_v35 }
 0x100   : > { %2432 = vmatprep.subr.mxu1 %v1872_v35  ;;  %2410 = vmatpush3.msra.mxu0 %v1872_v35 }
 0x101   : > { %2448 = vmatpush3.msra.mxu1 %v1872_v35  ;;  %2411 = vmatprep.mubr.f32.mxu0 %v1868_v36  ;;  %v1888_v36 = vld [vmem:[%s3247_s2] ss:$0 sm:$0xff] }
 0x102   : > { %2414 = vmatprep.mubr.f32.mxu1 %v1870_v37  ;;  %2412 = vmatmul.mubr.f32.vlgmr.msra.gmra.mxu0 %v1869_v38 }
 0x103   : > { %2415 = vmatmul.mubr.f32.vlgmr.msra.gmra.mxu1 %v1871_v39 }
 0x132   : > { %v2109_v41 = vpop.f32.mrf.mxu0 }
 0x133   : > { %v2147_v44 = vpop.f32.mrf.mxu1 }
 0x134   : > { %v560_v42 = vpop.f32.mrf.mxu0  ;;  %v651_v63 = vadd.f32 %v2147_v44, %v2109_v41 }
 0x135   : > { %v645_v46 = vpop.f32.mrf.mxu1 }
 0x136   : > { %v646_v3 = vadd.f32 %v645_v46, %v560_v42 }
 0x14f   : > { %v2112_v43 = vpop.f32.mrf.mxu0 }
 0x150   : > { %v2150_v48 = vpop.f32.mrf.mxu1 }
 0x151   : > { %v570_v45 = vpop.f32.mrf.mxu0  ;;  %v661_v0 = vadd.f32 %v2150_v48, %v2112_v43 }
 0x152   : > { %v655_v50 = vpop.f32.mrf.mxu1 }
 0x153   : > { %v656_v4 = vadd.f32 %v655_v50, %v570_v45 }
 0x156   : > { %v2185_v47 = vpop.f32.mrf.mxu0 }
 0x157   : > { %v2223_v52 = vpop.f32.mrf.mxu1  ;;  %v775_v5 = vadd.f32 %v2185_v47, %v651_v63 }
 0x158   : > { %v755_v49 = vpop.f32.mrf.mxu0 }
 0x159   : > { %v869_v54 = vpop.f32.mrf.mxu1  ;;  %v774_v7 = vadd.f32 %v755_v49, %v646_v3  ;;  %v889_v11 = vadd.f32 %v2223_v52, %v775_v5 }
 0x15b   : > { %v888_v14 = vadd.f32 %v869_v54, %v774_v7 }
 0x15c   : > { %v2188_v51 = vpop.f32.mrf.mxu0 }
 0x15d   : > { %v777_v6 = vadd.f32 %v2188_v51, %v661_v0 }
 0x15e   : > { %v765_v53 = vpop.f32.mrf.mxu0 }
 0x15f   : > { %v2226_v56 = vpop.f32.mrf.mxu1  ;;  %v776_v8 = vadd.f32 %v765_v53, %v656_v4 }
 0x160   : > { %v891_v12 = vadd.f32 %v2226_v56, %v777_v6 }
 0x161   : > { %v879_v58 = vpop.f32.mrf.mxu1 }
 0x162   : > { %v890_v15 = vadd.f32 %v879_v58, %v776_v8 }
 0x17a   : > { %v2261_v55 = vpop.f32.mrf.mxu0 }
 0x17b   : > { %v2299_v59 = vpop.f32.mrf.mxu1  ;;  %v1003_v16 = vadd.f32 %v2261_v55, %v889_v11 }
 0x17c   : > { %v983_v57 = vpop.f32.mrf.mxu0 }
 0x17d   : > { %v1097_v61 = vpop.f32.mrf.mxu1  ;;  %v1002_v19 = vadd.f32 %v983_v57, %v888_v14  ;;  %v1117_v22 = vadd.f32 %v2299_v59, %v1003_v16 }
 0x17f   : > { %v1116_v26 = vadd.f32 %v1097_v61, %v1002_v19 }
 0x180   : > { %v2264_v60 = vpop.f32.mrf.mxu0 }
 0x181   : > { %v1005_v17 = vadd.f32 %v2264_v60, %v891_v12 }
 0x182   : > { %v993_v62 = vpop.f32.mrf.mxu0 }
 0x183   : > { %v2302_v1 = vpop.f32.mrf.mxu1  ;;  %v1004_v20 = vadd.f32 %v993_v62, %v890_v15 }
 0x184   : > { %v1119_v23 = vadd.f32 %v2302_v1, %v1005_v17 }
 0x185   : > { %v1107_v9 = vpop.f32.mrf.mxu1 }
 0x186   : > { %v1118_v27 = vadd.f32 %v1107_v9, %v1004_v20 }
 0x19e   : > { %v2337_v2 = vpop.f32.mrf.mxu0 }
 0x19f   : > { %v2375_v13 = vpop.f32.mrf.mxu1  ;;  %v1231_v28 = vadd.f32 %v2337_v2, %v1117_v22 }
 0x1a0   : > { %v1211_v10 = vpop.f32.mrf.mxu0 }
 0x1a1   : > { %v1325_v21 = vpop.f32.mrf.mxu1  ;;  %v1230_v30 = vadd.f32 %v1211_v10, %v1116_v26  ;;  %v1345_v33 = vadd.f32 %v2375_v13, %v1231_v28 }
 0x1a3   : > { %v1344_v38 = vadd.f32 %v1325_v21, %v1230_v30 }
 0x1a4   : > { %v2340_v18 = vpop.f32.mrf.mxu0 }
 0x1a5   : > { %v1233_v29 = vadd.f32 %v2340_v18, %v1119_v23 }
 0x1a6   : > { %v1221_v24 = vpop.f32.mrf.mxu0 }
 0x1a7   : > { %v2378_v25 = vpop.f32.mrf.mxu1  ;;  %v1232_v31 = vadd.f32 %v1221_v24, %v1118_v27 }
 0x1a8   : > { %v1347_v34 = vadd.f32 %v2378_v25, %v1233_v29 }
 0x1a9   : > { %v1335_v32 = vpop.f32.mrf.mxu1 }
 0x1aa   : > { %v1346_v39 = vadd.f32 %v1335_v32, %v1232_v31 }
 0x1c2   : > { %v2413_v35 = vpop.f32.mrf.mxu0 }
 0x1c3   : > { %v2416_v37 = vpop.f32.mrf.mxu1  ;;  %v1459_v40 = vadd.f32 %v2413_v35, %v1345_v33 }
 0x1c4   : > { %v1461_v41 = vadd.f32 %v2416_v37, %v1347_v34  ;;  %v1439_v42 = vpop.f32.mrf.mxu0 }
 0x1c5   : > { %v1449_v43 = vpop.f32.mrf.mxu1  ;;  %v1470_v44 = vadd.f32 %v1888_v36, %v1459_v40  ;;  %v1458_v46 = vadd.f32 %v1439_v42, %v1344_v38 }
 0x1c6   : > { %v1472_v45 = vadd.f32 %v1888_v36, %v1461_v41  ;;  %v1460_v47 = vadd.f32 %v1449_v43, %v1346_v39 }
 0x1c7   : > { %v1474_v48 = vmax.f32 %v1470_v44, 0.0  ;;  %v1469_v50 = vadd.f32 %v1888_v36, %v1458_v46 }
 0x1c8   : > { %v1476_v49 = vmax.f32 %v1472_v45, 0.0  ;;  %v1471_v51 = vadd.f32 %v1888_v36, %v1460_v47 }
 0x1c9   : > { %1478 = vst [vmem:[%s2605_s4 + $0x11] sm:$0xff] %v1474_v48  ;;  %v1473_v52 = vmax.f32 %v1469_v50, 0.0 }
 0x1ca   : > { %1480 = vst [vmem:[%s2605_s4 + $0x31] sm:$0xff] %v1476_v49  ;;  %v1475_v53 = vmax.f32 %v1471_v51, 0.0 }
 0x1cb   : > { %1477 = vst [vmem:[%s2605_s4 + $0x1] sm:$0xff] %v1473_v52 }
 0x1cc   : > { %1479 = vst [vmem:[%s2605_s4 + $0x21] sm:$0xff] %v1475_v53 }
 0x1cd PF: > { %s13_s16 = sadd.s32 1, %s2538_s16   ;;  %s3249_s12 = smov %s2530_s14 }
 0x1ce   : > { %p10_p12 = scmp.ge.s32.totalorder %s13_s16, 6   ;;  %s3250_s13 = smov %s2534_s15 }
 0x1cf   : > { %s3251_s14 = smov %s3254_s17  ;;  %s3252_s15 = smov %s3258_s18 }
 0x1d0   :  { %12 = sbr.rel (!%p10_p12) target bundleno = 3 (0x3), region = 226 }
 0x1d5   :  { %1521 = vsyncmov [#allocation3] }
 0x1d8   :  { %s1522_s4 = vpop.sfrf %1521 }
 0x1d9   :  { %p1891_p13 = scmp.ne.s32.totalorder %s1522_s4, 0 }
 0x1db   :  { %1526 = shalt.err (%p1891_p13)  }
 0x1dc   :  { %1528 = vsyncmov [#allocation3 + $0x1] }
 0x1df   :  { %s1529_s27 = vpop.sfrf %1528 }
 0x1e0   :  { %p1892_p0 = scmp.ne.s32.totalorder %s1529_s27, 0 }
 0x1e2   :  { %1533 = shalt.err (%p1892_p0)  }

</bundles_post_ra>
